<compile_context>
chip_gen: v7x
topology: tpu7x:2x2x1
jax: 0.10.0
libtpu: 0.0.40
codegen_flags: <defaults>
</compile_context>

<pallas_src>
import jax
import jax.numpy as jnp
from jax.experimental import pallas as pl
from jax.experimental.pallas import tpu as pltpu

LANE = 128  # lane width; padded output-column count for the action head


def mlp_kernel(x_ref, w1_ref, b1_ref, w2_ref, b2_ref, w3_ref, b3_ref,
               w4_ref, b4_ref, o_ref):
    # dense: Linear(48,256)+ReLU -> Linear(256,512)+ReLU -> Linear(512,512)+ReLU
    h = jnp.dot(x_ref[...].astype(jnp.bfloat16), w1_ref[...],
                preferred_element_type=jnp.float32)
    h = jnp.maximum(h + b1_ref[...], 0.0)
    h = jnp.dot(h.astype(jnp.bfloat16), w2_ref[...],
                preferred_element_type=jnp.float32)
    h = jnp.maximum(h + b2_ref[...], 0.0)
    h = jnp.dot(h.astype(jnp.bfloat16), w3_ref[...],
                preferred_element_type=jnp.float32)
    h = jnp.maximum(h + b3_ref[...], 0.0)
    # action_scores: Linear(512, num_actions) zero-padded to 128 lanes, no act.
    q = jnp.dot(h.astype(jnp.bfloat16), w4_ref[...],
                preferred_element_type=jnp.float32)
    o_ref[...] = q + b4_ref[...]


def network_forward(x, packed_params, *, num_actions, block_b=128):
    """Full fused MLP; batch tiled over a parallel grid axis, weights resident."""
    (w1, b1), (w2, b2), (w3, b3), (w4, b4) = packed_params
    B, F = x.shape
    Bp = pl.cdiv(B, block_b) * block_b
    if Bp != B:
        x = jnp.pad(x, ((0, Bp - B), (0, 0)))
    grid = (Bp // block_b,)

    def resident(shape):
        # Same block for every grid step -> operand stays VMEM-resident.
        return pl.BlockSpec(shape, lambda i: tuple(0 for _ in shape))

    out_padded = pl.pallas_call(
        mlp_kernel,
        out_shape=jax.ShapeDtypeStruct((Bp, LANE), jnp.float32),
        grid=grid,
        in_specs=[
            pl.BlockSpec((block_b, F), lambda i: (i, 0)),
            resident(w1.shape), resident(b1.shape),
            resident(w2.shape), resident(b2.shape),
            resident(w3.shape), resident(b3.shape),
            resident(w4.shape), resident(b4.shape),
        ],
        out_specs=pl.BlockSpec((block_b, LANE), lambda i: (i, 0)),
        compiler_params=pltpu.CompilerParams(
            dimension_semantics=("parallel",),
            vmem_limit_bytes=32 * 1024 * 1024,
        ),
    )(x, w1, b1, w2, b2, w3, b3, w4, b4)
    return out_padded[:B, :num_actions]


def init_params(key, num_actions):
    """Deterministic init mimicking nn.Linear shapes (stored as (in, out), fp32)."""
    dims = [(48, 256), (256, 512), (512, 512), (512, num_actions)]
    params = []
    for (din, dout) in dims:
        key, kw, kb = jax.random.split(key, 3)
        bound = 1.0 / jnp.sqrt(din)
        w = jax.random.uniform(kw, (din, dout), jnp.float32, -bound, bound)
        b = jax.random.uniform(kb, (1, dout), jnp.float32, -bound, bound)
        params.append((w, b))
    return params


def pack_params(params, num_actions):
    """bf16 weights; zero-pad the action head to LANE output columns."""
    packed = []
    for i, (w, b) in enumerate(params):
        if i == 3:
            w = jnp.pad(w, ((0, 0), (0, LANE - num_actions)))
            b = jnp.pad(b, ((0, 0), (0, LANE - num_actions)))
        packed.append((w.astype(jnp.bfloat16), b.astype(jnp.float32)))
    return packed


def reference_forward(x, packed_params, num_actions):
    """fp32 reference using the same bf16-quantized weights (fp32 activations)."""
    h = x
    for i, (w, b) in enumerate(packed_params):
        h = h @ w.astype(jnp.float32) + b
        if i < 3:
            h = jnp.maximum(h, 0.0)
    return h[:, :num_actions]


if __name__ == "__main__":
    key = jax.random.PRNGKey(0)
    k_x, k_p = jax.random.split(key)

    batch = 8
    num_actions = 4
    x = jax.random.normal(k_x, (batch, 48), jnp.float32)
    params = init_params(k_p, num_actions)
    packed = pack_params(params, num_actions)

    qvalue = network_forward(x, packed, num_actions=num_actions)
    qvalue = jax.block_until_ready(qvalue)

    ref = reference_forward(x, packed, num_actions)
    assert qvalue.shape == (batch, num_actions)
    assert jnp.allclose(qvalue, ref, atol=2e-2, rtol=2e-2), \
        float(jnp.max(jnp.abs(qvalue - ref)))

    print("KERNEL_OK")
</pallas_src>

<mosaic_0001>
module attributes {stable_mosaic.version = 11 : i64} {
  func.func @mlp_kernel(%arg0: i32, %arg1: memref<128x48xf32, #tpu.memory_space<vmem>>, %arg2: memref<48x256xbf16, #tpu.memory_space<vmem>>, %arg3: memref<1x256xf32, #tpu.memory_space<vmem>>, %arg4: memref<256x512xbf16, #tpu.memory_space<vmem>>, %arg5: memref<1x512xf32, #tpu.memory_space<vmem>>, %arg6: memref<512x512xbf16, #tpu.memory_space<vmem>>, %arg7: memref<1x512xf32, #tpu.memory_space<vmem>>, %arg8: memref<512x128xbf16, #tpu.memory_space<vmem>>, %arg9: memref<1x128xf32, #tpu.memory_space<vmem>>, %arg10: memref<128x128xf32, #tpu.memory_space<vmem>>) attributes {dimension_semantics = [#tpu.dimension_semantics<parallel>], iteration_bounds = array<i64: 1>, scalar_prefetch = 0 : i64, scratch_operands = 0 : i64, tpu.core_type = #tpu.core_type<tc>, window_params = [{transform_indices = @transform_0, window_bounds = array<i64: 128, 48>}, {pipeline_mode = #tpu.pipeline_mode<synchronous>, transform_indices = @transform_1, window_bounds = array<i64: 48, 256>}, {pipeline_mode = #tpu.pipeline_mode<synchronous>, transform_indices = @transform_2, window_bounds = array<i64: 1, 256>}, {pipeline_mode = #tpu.pipeline_mode<synchronous>, transform_indices = @transform_3, window_bounds = array<i64: 256, 512>}, {pipeline_mode = #tpu.pipeline_mode<synchronous>, transform_indices = @transform_4, window_bounds = array<i64: 1, 512>}, {pipeline_mode = #tpu.pipeline_mode<synchronous>, transform_indices = @transform_5, window_bounds = array<i64: 512, 512>}, {pipeline_mode = #tpu.pipeline_mode<synchronous>, transform_indices = @transform_6, window_bounds = array<i64: 1, 512>}, {pipeline_mode = #tpu.pipeline_mode<synchronous>, transform_indices = @transform_7, window_bounds = array<i64: 512, 128>}, {pipeline_mode = #tpu.pipeline_mode<synchronous>, transform_indices = @transform_8, window_bounds = array<i64: 1, 128>}, {transform_indices = @transform_9, window_bounds = array<i64: 128, 128>}]} {
    %c0 = arith.constant 0 : index
    %c0_0 = arith.constant 0 : index
    %0 = vector.load %arg1[%c0, %c0_0] : memref<128x48xf32, #tpu.memory_space<vmem>>, vector<128x48xf32>
    %1 = arith.truncf %0 : vector<128x48xf32> to vector<128x48xbf16>
    %c0_1 = arith.constant 0 : index
    %c0_2 = arith.constant 0 : index
    %2 = vector.load %arg2[%c0_1, %c0_2] : memref<48x256xbf16, #tpu.memory_space<vmem>>, vector<48x256xbf16>
    %cst = arith.constant dense<0.000000e+00> : vector<128x256xf32>
    %3 = tpu.matmul %1, %2, %cst {dimension_numbers = #tpu.dot_dimension_numbers<[1], [0], [0], [1], [0, 0, 1, 1], [], []>} : vector<128x48xbf16>, vector<48x256xbf16>, vector<128x256xf32> -> vector<128x256xf32>
    %c0_3 = arith.constant 0 : index
    %c0_4 = arith.constant 0 : index
    %4 = vector.load %arg3[%c0_3, %c0_4] : memref<1x256xf32, #tpu.memory_space<vmem>>, vector<1x256xf32>
    %5 = vector.broadcast %4 : vector<1x256xf32> to vector<128x256xf32>
    %6 = arith.addf %3, %5 : vector<128x256xf32>
    %cst_5 = arith.constant 0.000000e+00 : f32
    %7 = vector.broadcast %cst_5 : f32 to vector<128x256xf32>
    %8 = arith.maximumf %6, %7 : vector<128x256xf32>
    %9 = arith.truncf %8 : vector<128x256xf32> to vector<128x256xbf16>
    %c0_6 = arith.constant 0 : index
    %c0_7 = arith.constant 0 : index
    %10 = vector.load %arg4[%c0_6, %c0_7] : memref<256x512xbf16, #tpu.memory_space<vmem>>, vector<256x512xbf16>
    %cst_8 = arith.constant dense<0.000000e+00> : vector<128x512xf32>
    %11 = tpu.matmul %9, %10, %cst_8 {dimension_numbers = #tpu.dot_dimension_numbers<[1], [0], [0], [1], [0, 0, 1, 1], [], []>} : vector<128x256xbf16>, vector<256x512xbf16>, vector<128x512xf32> -> vector<128x512xf32>
    %c0_9 = arith.constant 0 : index
    %c0_10 = arith.constant 0 : index
    %12 = vector.load %arg5[%c0_9, %c0_10] : memref<1x512xf32, #tpu.memory_space<vmem>>, vector<1x512xf32>
    %13 = vector.broadcast %12 : vector<1x512xf32> to vector<128x512xf32>
    %14 = arith.addf %11, %13 : vector<128x512xf32>
    %cst_11 = arith.constant 0.000000e+00 : f32
    %15 = vector.broadcast %cst_11 : f32 to vector<128x512xf32>
    %16 = arith.maximumf %14, %15 : vector<128x512xf32>
    %17 = arith.truncf %16 : vector<128x512xf32> to vector<128x512xbf16>
    %c0_12 = arith.constant 0 : index
    %c0_13 = arith.constant 0 : index
    %18 = vector.load %arg6[%c0_12, %c0_13] : memref<512x512xbf16, #tpu.memory_space<vmem>>, vector<512x512xbf16>
    %cst_14 = arith.constant dense<0.000000e+00> : vector<128x512xf32>
    %19 = tpu.matmul %17, %18, %cst_14 {dimension_numbers = #tpu.dot_dimension_numbers<[1], [0], [0], [1], [0, 0, 1, 1], [], []>} : vector<128x512xbf16>, vector<512x512xbf16>, vector<128x512xf32> -> vector<128x512xf32>
    %c0_15 = arith.constant 0 : index
    %c0_16 = arith.constant 0 : index
    %20 = vector.load %arg7[%c0_15, %c0_16] : memref<1x512xf32, #tpu.memory_space<vmem>>, vector<1x512xf32>
    %21 = vector.broadcast %20 : vector<1x512xf32> to vector<128x512xf32>
    %22 = arith.addf %19, %21 : vector<128x512xf32>
    %cst_17 = arith.constant 0.000000e+00 : f32
    %23 = vector.broadcast %cst_17 : f32 to vector<128x512xf32>
    %24 = arith.maximumf %22, %23 : vector<128x512xf32>
    %25 = arith.truncf %24 : vector<128x512xf32> to vector<128x512xbf16>
    %c0_18 = arith.constant 0 : index
    %c0_19 = arith.constant 0 : index
    %26 = vector.load %arg8[%c0_18, %c0_19] : memref<512x128xbf16, #tpu.memory_space<vmem>>, vector<512x128xbf16>
    %cst_20 = arith.constant dense<0.000000e+00> : vector<128x128xf32>
    %27 = tpu.matmul %25, %26, %cst_20 {dimension_numbers = #tpu.dot_dimension_numbers<[1], [0], [0], [1], [0, 0, 1, 1], [], []>} : vector<128x512xbf16>, vector<512x128xbf16>, vector<128x128xf32> -> vector<128x128xf32>
    %c0_21 = arith.constant 0 : index
    %c0_22 = arith.constant 0 : index
    %28 = vector.load %arg9[%c0_21, %c0_22] : memref<1x128xf32, #tpu.memory_space<vmem>>, vector<1x128xf32>
    %29 = vector.broadcast %28 : vector<1x128xf32> to vector<128x128xf32>
    %30 = arith.addf %27, %29 : vector<128x128xf32>
    %c0_23 = arith.constant 0 : index
    %c0_24 = arith.constant 0 : index
    %31 = vector.load %arg10[%c0_23, %c0_24] : memref<128x128xf32, #tpu.memory_space<vmem>>, vector<128x128xf32>
    tpu.vector_store %arg10[%c0_23, %c0_24], %30 {strides = array<i32>} : memref<128x128xf32, #tpu.memory_space<vmem>>, vector<128x128xf32>,
    return
  }
  func.func @transform_0(%arg0: i32) -> (i32, i32) {
    %c0_i32 = arith.constant 0 : i32
    %c0_i32_0 = arith.constant 0 : i32
    return %arg0, %c0_i32 : i32, i32
  }
  func.func @transform_1(%arg0: i32) -> (i32, i32) {
    %c0_i32 = arith.constant 0 : i32
    %c0_i32_0 = arith.constant 0 : i32
    %c0_i32_1 = arith.constant 0 : i32
    return %c0_i32, %c0_i32_0 : i32, i32
  }
  func.func @transform_2(%arg0: i32) -> (i32, i32) {
    %c0_i32 = arith.constant 0 : i32
    %c0_i32_0 = arith.constant 0 : i32
    %c0_i32_1 = arith.constant 0 : i32
    return %c0_i32, %c0_i32_0 : i32, i32
  }
  func.func @transform_3(%arg0: i32) -> (i32, i32) {
    %c0_i32 = arith.constant 0 : i32
    %c0_i32_0 = arith.constant 0 : i32
    %c0_i32_1 = arith.constant 0 : i32
    return %c0_i32, %c0_i32_0 : i32, i32
  }
  func.func @transform_4(%arg0: i32) -> (i32, i32) {
    %c0_i32 = arith.constant 0 : i32
    %c0_i32_0 = arith.constant 0 : i32
    %c0_i32_1 = arith.constant 0 : i32
    return %c0_i32, %c0_i32_0 : i32, i32
  }
  func.func @transform_5(%arg0: i32) -> (i32, i32) {
    %c0_i32 = arith.constant 0 : i32
    %c0_i32_0 = arith.constant 0 : i32
    %c0_i32_1 = arith.constant 0 : i32
    return %c0_i32, %c0_i32_0 : i32, i32
  }
  func.func @transform_6(%arg0: i32) -> (i32, i32) {
    %c0_i32 = arith.constant 0 : i32
    %c0_i32_0 = arith.constant 0 : i32
    %c0_i32_1 = arith.constant 0 : i32
    return %c0_i32, %c0_i32_0 : i32, i32
  }
  func.func @transform_7(%arg0: i32) -> (i32, i32) {
    %c0_i32 = arith.constant 0 : i32
    %c0_i32_0 = arith.constant 0 : i32
    %c0_i32_1 = arith.constant 0 : i32
    return %c0_i32, %c0_i32_0 : i32, i32
  }
  func.func @transform_8(%arg0: i32) -> (i32, i32) {
    %c0_i32 = arith.constant 0 : i32
    %c0_i32_0 = arith.constant 0 : i32
    %c0_i32_1 = arith.constant 0 : i32
    return %c0_i32, %c0_i32_0 : i32, i32
  }
  func.func @transform_9(%arg0: i32) -> (i32, i32) {
    %c0_i32 = arith.constant 0 : i32
    %c0_i32_0 = arith.constant 0 : i32
    return %arg0, %c0_i32 : i32, i32
  }
}

</mosaic_0001>

<bundles_post_ra>
// kernel: tpu_custom_call.1
= control target key start
LH: loop header
LB: loop body
LE: loop exit
PB: predicated region body
PF: predicated region fallthrough
CT: control target
= control target key end

     0   :  { %14 = vsyncpa [#allocation3], 0  ;;  %s4315_s0 = inlined_call_operand.vmem [shape: f32[128,48], index: 0, kind: input, shape index: {}]   ;;  %s4316_s1 = inlined_call_operand.vmem [shape: bf16[48,256], index: 1, kind: input, shape index: {}]   ;;  %s4317_s2 = inlined_call_operand.vmem [shape: f32[1,256], index: 2, kind: input, shape index: {}]   ;;  %s4318_s3 = inlined_call_operand.hbm [shape: bf16[256,512], index: 3, kind: input, shape index: {}]   ;;  %s4319_s4 = inlined_call_operand.vmem [shape: f32[1,512], index: 4, kind: input, shape index: {}]   ;;  %s4320_s5 = inlined_call_operand.hbm [shape: bf16[512,512], index: 5, kind: input, shape index: {}]   ;;  %s4321_s6 = inlined_call_operand.vmem [shape: f32[1,512], index: 6, kind: input, shape index: {}]   ;;  %s4322_s7 = inlined_call_operand.hbm [shape: bf16[512,128], index: 7, kind: input, shape index: {}]   ;;  %s4323_s8 = inlined_call_operand.vmem [shape: f32[1,128], index: 8, kind: input, shape index: {}]   ;;  %s4324_s9 = inlined_call_operand.hbm [shape: f32[128,128], index: 9, kind: output, shape index: {}]  }
   0x1   :  { %15 = vsyncpa [#allocation6], 0 }
   0x2   :  { %16 = vsyncpa [#allocation4], 0  ;;  %s3819_s30 = smov [#allocation5]   ;;  %s3820_s11 = smov [#allocation2]  }
   0x3   :  { %s42_s10 = sshll.u32 %s3819_s30, 4  ;;  %s28_s12 = sshll.u32 %s3820_s11, 4  ;;  %s43_s10 = int_to_ptr.vmem [resolvable:$true] %s42_s10  ;;  %s3880_s12 = int_to_ptr.vmem [resolvable:$true] %s28_s12 }
   0x4   :  { %s3725_s15 = scalar_lea.hbm %s4320_s5, 16384 }
   0x5   :  { %p3726_p0 = scmp.ne.s32.totalorder %s4320_s5, %s3725_s15  ;;  %p3729_p1 = scmp.lt.u32.totalorder %s3725_s15, %s4320_s5 }
   0x7   :  { %p3731_p2 = pnand %p3729_p1, %p3726_p0 }
   0x9   :  { %3734 = shalt.err (!%p3731_p2)
}
   0xa   :  { %s3735_s20 = scalar_lea.vmem %s43_s10, 16384  ;;  %p3740_p4 = scmp.lt.s32.totalorder %s43_s10, %s43_s10 }
   0xb   :  { %p3736_p3 = scmp.ne.s32.totalorder %s43_s10, %s3735_s20  ;;  %p3741_p5 = scmp.lt.s32.totalorder %s3735_s20, %s3735_s20 }
   0xd   :  { %p3742_p6 = por %p3741_p5, %p3740_p4 }
   0xf   :  { %p3743_p7 = pnand %p3742_p6, %p3736_p3 }
  0x11   :  { %3746 = shalt.err (!%p3743_p7)
}
  0x12   :  { %s3821_s21 = smov 256   ;;  %s3822_s22 = smov 16  }
  0x13   :  { %48 = dma.hbm_to_vmem [thread:$0]  %s4320_s5, 16384, %s43_s10, [#allocation6], %s3821_s21, %s3821_s21, %s3822_s22  }
  0x14   :  { %s3747_s27 = scalar_lea.hbm %s4318_s3, 8192 }
  0x15   :  { %p3748_p8 = scmp.ne.s32.totalorder %s4318_s3, %s3747_s27  ;;  %p3751_p9 = scmp.lt.u32.totalorder %s3747_s27, %s4318_s3 }
  0x17   :  { %p3753_p10 = pnand %p3751_p9, %p3748_p8 }
  0x19   :  { %3756 = shalt.err (!%p3753_p10)
}
  0x1a   :  { %s3757_s13 = scalar_lea.vmem %s3880_s12, 8192  ;;  %p3762_p12 = scmp.lt.s32.totalorder %s3880_s12, %s3880_s12 }
  0x1b   :  { %p3758_p11 = scmp.ne.s32.totalorder %s3880_s12, %s3757_s13  ;;  %p3763_p13 = scmp.lt.s32.totalorder %s3757_s13, %s3757_s13 }
  0x1d   :  { %p3764_p0 = por %p3763_p13, %p3762_p12 }
  0x1f   :  { %p3765_p1 = pnand %p3764_p0, %p3758_p11 }
  0x21   :  { %3768 = shalt.err (!%p3765_p1)
}
  0x22   :  { %34 = dma.hbm_to_vmem [thread:$0]  %s4318_s3, 8192, %s3880_s12, [#allocation3], %s3821_s21, %s3821_s21, %s3822_s22  }
  0x23   :  { %s3823_s14 = smov [#allocation7]   ;;  %s3769_s18 = scalar_lea.hbm %s4322_s7, 4096 }
  0x24   :  { %s56_s15 = sshll.u32 %s3823_s14, 4  ;;  %p3770_p2 = scmp.ne.s32.totalorder %s4322_s7, %s3769_s18  ;;  %s57_s15 = int_to_ptr.vmem [resolvable:$true] %s56_s15 }
  0x25   :  { %p3773_p3 = scmp.lt.u32.totalorder %s3769_s18, %s4322_s7 }
  0x27   :  { %p3775_p4 = pnand %p3773_p3, %p3770_p2 }
  0x29   :  { %3778 = shalt.err (!%p3775_p4)
}
  0x2a   :  { %s3779_s25 = scalar_lea.vmem %s57_s15, 4096  ;;  %p3784_p6 = scmp.lt.s32.totalorder %s57_s15, %s57_s15 }
  0x2b   :  { %p3780_p5 = scmp.ne.s32.totalorder %s57_s15, %s3779_s25  ;;  %p3785_p7 = scmp.lt.s32.totalorder %s3779_s25, %s3779_s25 }
  0x2d   :  { %p3786_p8 = por %p3785_p7, %p3784_p6 }
  0x2f   :  { %p3787_p9 = pnand %p3786_p8, %p3780_p5 }
  0x31   :  { %3790 = shalt.err (!%p3787_p9)
}
  0x32   :  { %s3824_s3 = smov 64   ;;  %s3825_s12 = smov 4  }
  0x33   :  { %62 = dma.hbm_to_vmem [thread:$0]  %s4322_s7, 4096, %s57_s15, [#allocation6], %s3824_s3, %s3824_s3, %s3825_s12  }
  0x34   :  { %3813 = dma.done.wait [#allocation3], 8192  }
  0x35   :  { %3814 = vsyncadd [#allocation3], 4294959104 }
  0x36   :  { %3815 = dma.done.wait [#allocation6], 20480  }
  0x37   :  { %3816 = vsyncadd [#allocation6], 4294946816  ;;  %v3826_v0 = vmov 0   ;;  %v3396_v1 = vld [vmem:[%s4316_s1 + $0x4] ss:$8 sps:$4 sm:$0xff]   ;;  %vm147_vm0 = vcmask 392192  }
  0x38   :  { %204 = vmatprep.mubr.bf16.mxu0 %v3826_v0  ;;  %v3398_v2 = vld [vmem:[%s4316_s1] ss:$8 sps:$4 sm:$0xff]   ;;  %172 = vmatprep.subr.bf16.mxu0 %v3396_v1  ;;  %v3399_v3 = vld [vmem:[%s4316_s1 + $0x14] ss:$8 sps:$4 sm:$0xff]   ;;  %v3401_v4 = vld [vmem:[%s4316_s1 + $0x10] ss:$8 sps:$4 sm:$0xff]  }
  0x39   :  { %173 = vmatpush1.bf16.msra.mxu0 %v3398_v2  ;;  %v3402_v5 = vld [vmem:[%s4316_s1 + $0x24] ss:$8 sps:$4 sm:$0xff]   ;;  %v3404_v6 = vld [vmem:[%s4316_s1 + $0x20] ss:$8 sps:$4 sm:$0xff]   ;;  %v77_v15 = vld [vmem:[%s4315_s0 + $0x10] sm:$0xff] }
  0x3a   :  { %174 = vmatprep.subr.bf16.mxu0 %v3399_v3  ;;  %v75_v7 = vld [vmem:[%s4315_s0] sm:$0xff]  ;;  %v76_v8 = vld [vmem:[%s4315_s0 + $0x8] sm:$0xff]  ;;  %v78_v16 = vld [vmem:[%s4315_s0 + $0x18] sm:$0xff] }
  0x3b   :  { %v91_v9 = vpack.c.bf16 %v76_v8, %v75_v7  ;;  %v3405_v10 = vld [vmem:[#allocation2 + $0x4] ss:$16 sps:$4 sm:$0xff]   ;;  %v3407_v11 = vld [vmem:[#allocation2 + $0x8] ss:$16 sps:$4 sm:$0xff]   ;;  %v3409_v12 = vld [vmem:[#allocation2 + $0xc] ss:$16 sps:$4 sm:$0xff]   ;;  %v92_v23 = vpack.c.bf16 %v78_v16, %v77_v15 }
  0x3c   :  { %v3410_v13 = vld [vmem:[#allocation2] ss:$16 sps:$4 sm:$0xff]   ;;  %739 = vmatprep.subr.bf16.mxu1 %v3405_v10  ;;  %v3411_v14 = vld [vmem:[#allocation2 + $0x24] ss:$16 sps:$4 sm:$0xff]   ;;  %v3413_v17 = vld [vmem:[#allocation2 + $0x28] ss:$16 sps:$4 sm:$0xff]  }
  0x3d   :  { %175 = vmatpush1.bf16.msra.mxu0 %v3401_v4  ;;  %740 = vmatpush1.bf16.msra.mxu1 %v3410_v13  ;;  %v3415_v18 = vld [vmem:[#allocation2 + $0x2c] ss:$16 sps:$4 sm:$0xff]   ;;  %v3416_v19 = vld [vmem:[#allocation2 + $0x20] ss:$16 sps:$4 sm:$0xff]   ;;  %v3417_v20 = vld [vmem:[#allocation2 + $0x44] ss:$16 sps:$4 sm:$0xff]  }
  0x3e   :  { %176 = vmatprep.subr.bf16.mxu0 %v3402_v5  ;;  %741 = vmatprep.subr.bf16.mxu1 %v3411_v14  ;;  %v3421_v21 = vld [vmem:[#allocation2 + $0x4c] ss:$16 sps:$4 sm:$0xff]   ;;  %v3422_v22 = vld [vmem:[#allocation2 + $0x40] ss:$16 sps:$4 sm:$0xff]   ;;  %v3423_v24 = vld [vmem:[#allocation2 + $0x64] ss:$16 sps:$4 sm:$0xff]  }
  0x3f   :  { %v3419_v25 = vld [vmem:[#allocation2 + $0x48] ss:$16 sps:$4 sm:$0xff]   ;;  %v3427_v26 = vld [vmem:[#allocation2 + $0x6c] ss:$16 sps:$4 sm:$0xff]   ;;  %v79_v27 = vld [vmem:[%s4315_s0 + $0x20] sm:$0xff] }
  0x40   :  { %v3428_v28 = vld [vmem:[#allocation2 + $0x60] ss:$16 sps:$4 sm:$0xff]   ;;  %v80_v29 = vld [vmem:[%s4315_s0 + $0x28] sm:$0xff]  ;;  %v3429_v30 = vld [vmem:[#allocation2 + $0x84] ss:$16 sps:$4 sm:$0xff]  }
  0x41   :  { %177 = vmatpush1.bf16.msra.mxu0 %v3404_v6  ;;  %742 = vmatpush1.bf16.msra.mxu1 %v3416_v19  ;;  %v3425_v31 = vld [vmem:[#allocation2 + $0x68] ss:$16 sps:$4 sm:$0xff]   ;;  %v3433_v32 = vld [vmem:[#allocation2 + $0x8c] ss:$16 sps:$4 sm:$0xff]   ;;  %v3434_v33 = vld [vmem:[#allocation2 + $0x80] ss:$16 sps:$4 sm:$0xff]   ;;  %v93_v34 = vpack.c.bf16 %v80_v29, %v79_v27 }
  0x42   :  { %852 = vmatprep.subr.bf16.mxu0 %v3409_v12  ;;  %743 = vmatprep.subr.bf16.mxu1 %v3417_v20  ;;  %v3435_v35 = vld [vmem:[#allocation2 + $0xa4] ss:$16 sps:$4 sm:$0xff]   ;;  %v3431_v36 = vld [vmem:[#allocation2 + $0x88] ss:$16 sps:$4 sm:$0xff]   ;;  %v3439_v37 = vld [vmem:[#allocation2 + $0xac] ss:$16 sps:$4 sm:$0xff]  }
  0x43   :  { %v81_v38 = vld [vmem:[%s4315_s0 + $0x30] sm:$0xff]  ;;  %v82_v40 = vld [vmem:[%s4315_s0 + $0x38] sm:$0xff]  ;;  %v83_v49 = vld [vmem:[%s4315_s0 + $0x40] sm:$0xff] }
  0x44   :  { %2896 = vmatmul.mubr.msk.bf16.vlgmr.msra.gmra.mrb[0].mxu0 %vm147_vm0, %v91_v9  ;;  %v3440_v39 = vld [vmem:[#allocation2 + $0xa0] ss:$16 sps:$4 sm:$0xff]   ;;  %v3441_v41 = vld [vmem:[#allocation2 + $0xc4] ss:$16 sps:$4 sm:$0xff]   ;;  %v3437_v42 = vld [vmem:[#allocation2 + $0xa8] ss:$16 sps:$4 sm:$0xff]   ;;  %v94_v45 = vpack.c.bf16 %v82_v40, %v81_v38 }
  0x45   :  { %214 = vmatprep.mubr.bf16.mxu0 %v3826_v0  ;;  %853 = vmatpush1.bf16.msra.mxu0 %v3407_v11  ;;  %v3445_v43 = vld [vmem:[#allocation2 + $0xcc] ss:$16 sps:$4 sm:$0xff]   ;;  %v3446_v44 = vld [vmem:[#allocation2 + $0xc0] ss:$16 sps:$4 sm:$0xff]   ;;  %v3447_v46 = vld [vmem:[#allocation2 + $0xe4] ss:$16 sps:$4 sm:$0xff]  }
  0x46   :  { %854 = vmatprep.subr.bf16.mxu0 %v3415_v18  ;;  %744 = vmatpush1.bf16.msra.mxu1 %v3422_v22  ;;  %v3443_v47 = vld [vmem:[#allocation2 + $0xc8] ss:$16 sps:$4 sm:$0xff]   ;;  %v3451_v48 = vld [vmem:[#allocation2 + $0xec] ss:$16 sps:$4 sm:$0xff]   ;;  %v3452_v50 = vld [vmem:[#allocation2 + $0xe0] ss:$16 sps:$4 sm:$0xff]  }
  0x47   :  { %745 = vmatprep.subr.bf16.mxu1 %v3423_v24  ;;  %v84_v51 = vld [vmem:[%s4315_s0 + $0x48] sm:$0xff]  ;;  %v3453_v52 = vld [vmem:[#allocation2 + $0x104] ss:$16 sps:$4 sm:$0xff]   ;;  %v3458_v55 = vld [vmem:[#allocation2 + $0x100] ss:$16 sps:$4 sm:$0xff]  }
  0x48   :  { %v3449_v53 = vld [vmem:[#allocation2 + $0xe8] ss:$16 sps:$4 sm:$0xff]   ;;  %v3457_v54 = vld [vmem:[#allocation2 + $0x10c] ss:$16 sps:$4 sm:$0xff]   ;;  %v95_v56 = vpack.c.bf16 %v84_v51, %v83_v49  ;;  %v3459_v57 = vld [vmem:[#allocation2 + $0x124] ss:$16 sps:$4 sm:$0xff]  }
  0x49   :  { %855 = vmatpush1.bf16.msra.mxu0 %v3413_v17  ;;  %v3455_v58 = vld [vmem:[#allocation2 + $0x108] ss:$16 sps:$4 sm:$0xff]   ;;  %v3463_v59 = vld [vmem:[#allocation2 + $0x12c] ss:$16 sps:$4 sm:$0xff]   ;;  %v85_v60 = vld [vmem:[%s4315_s0 + $0x50] sm:$0xff] }
  0x4a   :  { %856 = vmatprep.subr.bf16.mxu0 %v3421_v21  ;;  %746 = vmatpush1.bf16.msra.mxu1 %v3428_v28  ;;  %v86_v61 = vld [vmem:[%s4315_s0 + $0x58] sm:$0xff]  ;;  %v3464_v63 = vld [vmem:[#allocation2 + $0x120] ss:$16 sps:$4 sm:$0xff]   ;;  %v3465_v1 = vld [vmem:[#allocation2 + $0x144] ss:$16 sps:$4 sm:$0xff]  }
  0x4b   :  { %747 = vmatprep.subr.bf16.mxu1 %v3429_v30  ;;  %v3461_v62 = vld [vmem:[#allocation2 + $0x128] ss:$16 sps:$4 sm:$0xff]   ;;  %v3469_v2 = vld [vmem:[#allocation2 + $0x14c] ss:$16 sps:$4 sm:$0xff]   ;;  %v3470_v3 = vld [vmem:[#allocation2 + $0x140] ss:$16 sps:$4 sm:$0xff]   ;;  %v96_v6 = vpack.c.bf16 %v86_v61, %v85_v60 }
  0x4c   :  { %2897 = vmatmul.mubr.msk.bf16.gmra.mrb[4].mxu0 %vm147_vm0, %v92_v23  ;;  %v3471_v4 = vld [vmem:[#allocation2 + $0x164] ss:$16 sps:$4 sm:$0xff]   ;;  %v3467_v5 = vld [vmem:[#allocation2 + $0x148] ss:$16 sps:$4 sm:$0xff]   ;;  %v3475_v7 = vld [vmem:[#allocation2 + $0x16c] ss:$16 sps:$4 sm:$0xff]  }
  0x4d   :  { %224 = vmatprep.mubr.bf16.mxu0 %v3826_v0  ;;  %857 = vmatpush1.bf16.msra.mxu0 %v3419_v25  ;;  %v3476_v8 = vld [vmem:[#allocation2 + $0x160] ss:$16 sps:$4 sm:$0xff]   ;;  %v3477_v9 = vld [vmem:[#allocation2 + $0x184] ss:$16 sps:$4 sm:$0xff]   ;;  %v88_v11 = vld [vmem:[%s4315_s0 + $0x68] sm:$0xff] }
  0x4e   :  { %858 = vmatprep.subr.bf16.mxu0 %v3427_v26  ;;  %748 = vmatpush1.bf16.msra.mxu1 %v3434_v33  ;;  %v87_v10 = vld [vmem:[%s4315_s0 + $0x60] sm:$0xff]  ;;  %v3473_v12 = vld [vmem:[#allocation2 + $0x168] ss:$16 sps:$4 sm:$0xff]   ;;  %v3481_v13 = vld [vmem:[#allocation2 + $0x18c] ss:$16 sps:$4 sm:$0xff]   ;;  %v107_v33 = vlaneseq }
  0x4f   :  { %749 = vmatprep.subr.bf16.mxu1 %v3435_v35  ;;  %v3482_v14 = vld [vmem:[#allocation2 + $0x180] ss:$16 sps:$4 sm:$0xff]   ;;  %v3483_v15 = vld [vmem:[#allocation2 + $0x1a4] ss:$16 sps:$4 sm:$0xff]   ;;  %v3479_v16 = vld [vmem:[#allocation2 + $0x188] ss:$16 sps:$4 sm:$0xff]   ;;  %v97_v17 = vpack.c.bf16 %v88_v11, %v87_v10 }
  0x50   :  { %v3487_v18 = vld [vmem:[#allocation2 + $0x1ac] ss:$16 sps:$4 sm:$0xff]   ;;  %v89_v19 = vld [vmem:[%s4315_s0 + $0x70] sm:$0xff]  ;;  %v3485_v21 = vld [vmem:[#allocation2 + $0x1a8] ss:$16 sps:$4 sm:$0xff]  }
  0x51   :  { %859 = vmatpush1.bf16.msra.mxu0 %v3425_v31  ;;  %v90_v20 = vld [vmem:[%s4315_s0 + $0x78] sm:$0xff]  ;;  %v3488_v23 = vld [vmem:[#allocation2 + $0x1a0] ss:$16 sps:$4 sm:$0xff]   ;;  %v3489_v24 = vld [vmem:[#allocation2 + $0x1c4] ss:$16 sps:$4 sm:$0xff]  }
  0x52   :  { %860 = vmatprep.subr.bf16.mxu0 %v3433_v32  ;;  %750 = vmatpush1.bf16.msra.mxu1 %v3440_v39  ;;  %v98_v22 = vpack.c.bf16 %v90_v20, %v89_v19  ;;  %v3493_v25 = vld [vmem:[#allocation2 + $0x1cc] ss:$16 sps:$4 sm:$0xff]   ;;  %v3491_v26 = vld [vmem:[#allocation2 + $0x1c8] ss:$16 sps:$4 sm:$0xff]   ;;  %v3494_v27 = vld [vmem:[#allocation2 + $0x1c0] ss:$16 sps:$4 sm:$0xff]  }
  0x53   :  { %751 = vmatprep.subr.bf16.mxu1 %v3441_v41  ;;  %v3495_v28 = vld [vmem:[#allocation2 + $0x1e4] ss:$16 sps:$4 sm:$0xff]   ;;  %v3499_v29 = vld [vmem:[#allocation2 + $0x1ec] ss:$16 sps:$4 sm:$0xff]   ;;  %v3497_v30 = vld [vmem:[#allocation2 + $0x1e8] ss:$16 sps:$4 sm:$0xff]  }
  0x54   :  { %2898 = vmatmul.mubr.msk.bf16.gmra.mrb[8].mxu0 %vm147_vm0, %v93_v34  ;;  %v3503_v31 = vld [vmem:[#allocation5 + $0x4] ss:$16 sps:$4 sm:$0xff]   ;;  %v3506_v32 = vld [vmem:[#allocation5 + $0xc] ss:$16 sps:$4 sm:$0xff]   ;;  %v4005_v34 = vshrl.u32 %v107_v33, 7 }
  0x55   :  { %234 = vmatprep.mubr.bf16.mxu0 %v3826_v0  ;;  %861 = vmatpush1.bf16.msra.mxu0 %v3431_v36  ;;  %v105_v36 = vld [vmem:[%s4317_s2] sm:$0x3]  ;;  %v3512_v60 = vld [vmem:[#allocation5 + $0x2c] ss:$16 sps:$4 sm:$0xff]  }
  0x56   :  { %862 = vmatprep.subr.bf16.mxu0 %v3439_v37  ;;  %752 = vmatpush1.bf16.msra.mxu1 %v3446_v44  ;;  %v4008_v35 = vsub.s32 0, %v4005_v34  ;;  %v4014_v37 = vsub.s32 1, %v4005_v34  ;;  %v3524_v19 = vld [vmem:[#allocation5 + $0x6c] ss:$16 sps:$4 sm:$0xff]  }
  0x57   :  { %753 = vmatprep.subr.bf16.mxu1 %v3447_v46 }
  0x58   :  { %v4017_v38 = vrot.slane %v105_v36, %v4008_v35  ;;  %v4020_v39 = vrot.slane %v105_v36, %v4014_v37 }
  0x59   :  { %863 = vmatpush1.bf16.msra.mxu0 %v3437_v42 }
  0x5a   :  { %864 = vmatprep.subr.bf16.mxu0 %v3445_v43  ;;  %754 = vmatpush1.bf16.msra.mxu1 %v3452_v50 }
  0x5b   :  { %755 = vmatprep.subr.bf16.mxu1 %v3453_v52 }
  0x5c   :  { %2899 = vmatmul.mubr.msk.bf16.gmra.mrb[12].mxu0 %vm147_vm0, %v94_v45 }
  0x5d   :  { %244 = vmatprep.mubr.bf16.mxu0 %v3826_v0  ;;  %865 = vmatpush1.bf16.msra.mxu0 %v3443_v47 }
  0x5e   :  { %866 = vmatprep.subr.bf16.mxu0 %v3451_v48  ;;  %756 = vmatpush1.bf16.msra.mxu1 %v3458_v55  ;;  %v3501_v55 = vld [vmem:[#allocation5] ss:$16 sps:$4 sm:$0xff]  }
  0x5f   :  { %757 = vmatprep.subr.bf16.mxu1 %v3459_v57 }
  0x61   :  { %867 = vmatpush1.bf16.msra.mxu0 %v3449_v53 }
  0x62   :  { %868 = vmatprep.subr.bf16.mxu0 %v3457_v54  ;;  %758 = vmatpush1.bf16.msra.mxu1 %v3464_v63 }
  0x63   :  { %759 = vmatprep.subr.bf16.mxu1 %v3465_v1 }
  0x64   :  { %2900 = vmatmul.mubr.msk.bf16.gmra.mrb[16].mxu0 %vm147_vm0, %v95_v56  ;;  %v3504_v56 = vld [vmem:[#allocation5 + $0x8] ss:$16 sps:$4 sm:$0xff]  }
  0x65   :  { %254 = vmatprep.mubr.bf16.mxu0 %v3826_v0  ;;  %869 = vmatpush1.bf16.msra.mxu0 %v3455_v58 }
  0x66   :  { %870 = vmatprep.subr.bf16.mxu0 %v3463_v59  ;;  %760 = vmatpush1.bf16.msra.mxu1 %v3470_v3  ;;  %v3509_v59 = vld [vmem:[#allocation5 + $0x24] ss:$16 sps:$4 sm:$0xff]   ;;  %v3507_v3 = vld [vmem:[#allocation5 + $0x20] ss:$16 sps:$4 sm:$0xff]  }
  0x67   :  { %761 = vmatprep.subr.bf16.mxu1 %v3471_v4  ;;  %v3510_v4 = vld [vmem:[#allocation5 + $0x28] ss:$16 sps:$4 sm:$0xff]  }
  0x69   :  { %871 = vmatpush1.bf16.msra.mxu0 %v3461_v62 }
  0x6a   :  { %872 = vmatprep.subr.bf16.mxu0 %v3469_v2  ;;  %762 = vmatpush1.bf16.msra.mxu1 %v3476_v8  ;;  %v3518_v8 = vld [vmem:[#allocation5 + $0x4c] ss:$16 sps:$4 sm:$0xff]  }
  0x6b   :  { %763 = vmatprep.subr.bf16.mxu1 %v3477_v9 }
  0x6c   :  { %2901 = vmatmul.mubr.msk.bf16.gmra.mrb[20].mxu0 %vm147_vm0, %v96_v6 }
  0x6d   :  { %264 = vmatprep.mubr.bf16.mxu0 %v3826_v0  ;;  %873 = vmatpush1.bf16.msra.mxu0 %v3467_v5 }
  0x6e   :  { %874 = vmatprep.subr.bf16.mxu0 %v3475_v7  ;;  %764 = vmatpush1.bf16.msra.mxu1 %v3482_v14  ;;  %v3515_v7 = vld [vmem:[#allocation5 + $0x44] ss:$16 sps:$4 sm:$0xff]   ;;  %v3513_v14 = vld [vmem:[#allocation5 + $0x40] ss:$16 sps:$4 sm:$0xff]  }
  0x6f   :  { %765 = vmatprep.subr.bf16.mxu1 %v3483_v15  ;;  %v3516_v15 = vld [vmem:[#allocation5 + $0x48] ss:$16 sps:$4 sm:$0xff]  }
  0x71   :  { %875 = vmatpush1.bf16.msra.mxu0 %v3473_v12 }
  0x72   :  { %876 = vmatprep.subr.bf16.mxu0 %v3481_v13  ;;  %766 = vmatpush1.bf16.msra.mxu1 %v3488_v23 }
  0x73   :  { %767 = vmatprep.subr.bf16.mxu1 %v3489_v24 }
  0x74   :  { %2902 = vmatmul.mubr.msk.bf16.gmra.mrb[24].mxu0 %vm147_vm0, %v97_v17 }
  0x75   :  { %274 = vmatprep.mubr.bf16.mxu0 %v3826_v0  ;;  %877 = vmatpush1.bf16.msra.mxu0 %v3479_v16  ;;  %v3500_v0 = vld [vmem:[#allocation2 + $0x1e0] ss:$16 sps:$4 sm:$0xff]  }
  0x76   :  { %878 = vmatprep.subr.bf16.mxu0 %v3487_v18  ;;  %768 = vmatpush1.bf16.msra.mxu1 %v3494_v27  ;;  %v3521_v18 = vld [vmem:[#allocation5 + $0x64] ss:$16 sps:$4 sm:$0xff]  }
  0x77   :  { %769 = vmatprep.subr.bf16.mxu1 %v3495_v28 }
  0x79   :  { %879 = vmatpush1.bf16.msra.mxu0 %v3485_v21 }
  0x7a   :  { %880 = vmatprep.subr.bf16.mxu0 %v3493_v25  ;;  %770 = vmatpush1.bf16.msra.mxu1 %v3500_v0  ;;  %v3519_v25 = vld [vmem:[#allocation5 + $0x60] ss:$16 sps:$4 sm:$0xff]  }
  0x7b   :  { %1851 = vmatprep.subr.bf16.mxu1 %v3503_v31 }
  0x7c   :  { %2903 = vmatmul.mubr.msk.bf16.gmra.mrb[28].mxu0 %vm147_vm0, %v98_v22 }
  0x7d   :  { %881 = vmatpush1.bf16.msra.mxu0 %v3491_v26  ;;  %v3522_v26 = vld [vmem:[#allocation5 + $0x68] ss:$16 sps:$4 sm:$0xff]  }
  0x7e   :  { %882 = vmatprep.subr.bf16.mxu0 %v3499_v29  ;;  %v3527_v29 = vld [vmem:[#allocation5 + $0x84] ss:$16 sps:$4 sm:$0xff]  }
  0x81   :  { %883 = vmatpush1.bf16.msra.mxu0 %v3497_v30  ;;  %v3530_v30 = vld [vmem:[#allocation5 + $0x8c] ss:$16 sps:$4 sm:$0xff]  }
  0x82   :  { %2077 = vmatprep.subr.bf16.mxu0 %v3506_v32 }
 0x117   :  { %v206_v40 = vpop.f32.mrb[0].mxu0 }
 0x118   :  { %v207_v41 = vadd.f32 %v206_v40, %v4017_v38  ;;  %v208_v42 = vpop.f32.mrb[1].mxu0  ;;  %v3525_v40 = vld [vmem:[#allocation5 + $0x80] ss:$16 sps:$4 sm:$0xff]  }
 0x119   :  { %v209_v43 = vadd.f32 %v208_v42, %v4020_v39  ;;  %v210_v44 = vpop.f32.mrb[2].mxu0 }
 0x11a   :  { %v211_v45 = vadd.f32 %v210_v44, %v4017_v38  ;;  %v212_v46 = vpop.f32.mrb[3].mxu0  ;;  %v285_v48 = vmax.f32 %v207_v41, 0.0  ;;  %v3528_v41 = vld [vmem:[#allocation5 + $0x88] ss:$16 sps:$4 sm:$0xff]   ;;  %v3533_v44 = vld [vmem:[#allocation5 + $0xa4] ss:$16 sps:$4 sm:$0xff]  }
 0x11b   :  { %v213_v47 = vadd.f32 %v212_v46, %v4020_v39  ;;  %v286_v50 = vmax.f32 %v209_v43, 0.0 }
 0x11c   :  { %v287_v49 = vmax.f32 %v211_v45, 0.0  ;;  %v3536_v45 = vld [vmem:[#allocation5 + $0xac] ss:$16 sps:$4 sm:$0xff]  }
 0x11d   :  { %v288_v51 = vmax.f32 %v213_v47, 0.0 }
 0x11e   :  { %v317_v52 = vpack.c.bf16 %v287_v49, %v285_v48 }
 0x11f   :  { %v216_v53 = vpop.f32.mrb[4].mxu0  ;;  %v318_v54 = vpack.c.bf16 %v288_v51, %v286_v50  ;;  %v3531_v51 = vld [vmem:[#allocation5 + $0xa0] ss:$16 sps:$4 sm:$0xff]  }
 0x120   :  { %v217_v57 = vadd.f32 %v216_v53, %v4017_v38  ;;  %v218_v58 = vpop.f32.mrb[5].mxu0 }
 0x121   :  { %v219_v61 = vadd.f32 %v218_v58, %v4020_v39  ;;  %v220_v62 = vpop.f32.mrb[6].mxu0  ;;  %771 = vmatprep.mubr.bf16.mxu1 %v318_v54  ;;  %884 = vmatprep.mubr.bf16.mxu0 %v318_v54 }
 0x122   :  { %v221_v63 = vadd.f32 %v220_v62, %v4017_v38  ;;  %v222_v1 = vpop.f32.mrb[7].mxu0  ;;  %772 = vmatmul.mubr.bf16.vlgmr.msra.gmra.mrb[0].mxu1 %v317_v52  ;;  %885 = vmatmul.mubr.bf16.vlgmr.msra.gmra.mrb[32].mxu0 %v317_v52  ;;  %v289_v5 = vmax.f32 %v217_v57, 0.0  ;;  %v3534_v52 = vld [vmem:[#allocation5 + $0xa8] ss:$16 sps:$4 sm:$0xff]   ;;  %v3537_v62 = vld [vmem:[#allocation5 + $0xc0] ss:$16 sps:$4 sm:$0xff]  }
 0x123   :  { %v223_v2 = vadd.f32 %v222_v1, %v4020_v39  ;;  %1852 = vmatpush1.bf16.msra.mxu1 %v3501_v55  ;;  %2078 = vmatpush1.bf16.msra.mxu0 %v3504_v56  ;;  %v290_v9 = vmax.f32 %v219_v61, 0.0  ;;  %v3539_v55 = vld [vmem:[#allocation5 + $0xc4] ss:$16 sps:$4 sm:$0xff]   ;;  %v3542_v56 = vld [vmem:[#allocation5 + $0xcc] ss:$16 sps:$4 sm:$0xff]  }
 0x124   :  { %v291_v6 = vmax.f32 %v221_v63, 0.0  ;;  %1853 = vmatprep.subr.bf16.mxu1 %v3509_v59  ;;  %2079 = vmatprep.subr.bf16.mxu0 %v3512_v60  ;;  %v3540_v63 = vld [vmem:[#allocation5 + $0xc8] ss:$16 sps:$4 sm:$0xff]  }
 0x125   :  { %v292_v10 = vmax.f32 %v223_v2, 0.0 }
 0x126   :  { %v319_v11 = vpack.c.bf16 %v291_v6, %v289_v5 }
 0x127   :  { %v320_v12 = vpack.c.bf16 %v292_v10, %v290_v9  ;;  %v226_v13 = vpop.f32.mrb[8].mxu0  ;;  %1854 = vmatpush1.bf16.msra.mxu1 %v3507_v3  ;;  %2080 = vmatpush1.bf16.msra.mxu0 %v3510_v4  ;;  %v3545_v3 = vld [vmem:[#allocation5 + $0xe4] ss:$16 sps:$4 sm:$0xff]   ;;  %v3548_v4 = vld [vmem:[#allocation5 + $0xec] ss:$16 sps:$4 sm:$0xff]  }
 0x128   :  { %v227_v16 = vadd.f32 %v226_v13, %v4017_v38  ;;  %v228_v17 = vpop.f32.mrb[9].mxu0  ;;  %1855 = vmatprep.subr.bf16.mxu1 %v3515_v7  ;;  %2081 = vmatprep.subr.bf16.mxu0 %v3518_v8  ;;  %v3543_v10 = vld [vmem:[#allocation5 + $0xe0] ss:$16 sps:$4 sm:$0xff]  }
 0x129   :  { %v229_v20 = vadd.f32 %v228_v17, %v4020_v39  ;;  %v230_v21 = vpop.f32.mrb[10].mxu0  ;;  %781 = vmatprep.mubr.bf16.mxu1 %v320_v12  ;;  %894 = vmatprep.mubr.bf16.mxu0 %v320_v12 }
 0x12a   :  { %v231_v22 = vadd.f32 %v230_v21, %v4017_v38  ;;  %v232_v23 = vpop.f32.mrb[11].mxu0  ;;  %782 = vmatmul.mubr.bf16.gmra.mrb[4].mxu1 %v319_v11  ;;  %895 = vmatmul.mubr.bf16.gmra.mrb[36].mxu0 %v319_v11  ;;  %v293_v27 = vmax.f32 %v227_v16, 0.0  ;;  %v3546_v11 = vld [vmem:[#allocation5 + $0xe8] ss:$16 sps:$4 sm:$0xff]   ;;  %v3549_v21 = vld [vmem:[#allocation5 + $0x100] ss:$16 sps:$4 sm:$0xff]  }
 0x12b   :  { %v233_v24 = vadd.f32 %v232_v23, %v4020_v39  ;;  %1856 = vmatpush1.bf16.msra.mxu1 %v3513_v14  ;;  %2082 = vmatpush1.bf16.msra.mxu0 %v3516_v15  ;;  %v294_v0 = vmax.f32 %v229_v20, 0.0  ;;  %v3551_v14 = vld [vmem:[#allocation5 + $0x104] ss:$16 sps:$4 sm:$0xff]   ;;  %v3554_v15 = vld [vmem:[#allocation5 + $0x10c] ss:$16 sps:$4 sm:$0xff]  }
 0x12c   :  { %v295_v28 = vmax.f32 %v231_v22, 0.0  ;;  %1857 = vmatprep.subr.bf16.mxu1 %v3521_v18  ;;  %2083 = vmatprep.subr.bf16.mxu0 %v3524_v19  ;;  %v3552_v22 = vld [vmem:[#allocation5 + $0x108] ss:$16 sps:$4 sm:$0xff]  }
 0x12d   :  { %v296_v31 = vmax.f32 %v233_v24, 0.0 }
 0x12e   :  { %v321_v32 = vpack.c.bf16 %v295_v28, %v293_v27 }
 0x12f   :  { %v322_v33 = vpack.c.bf16 %v296_v31, %v294_v0  ;;  %v236_v36 = vpop.f32.mrb[12].mxu0  ;;  %1858 = vmatpush1.bf16.msra.mxu1 %v3519_v25  ;;  %2084 = vmatpush1.bf16.msra.mxu0 %v3522_v26  ;;  %v3557_v25 = vld [vmem:[#allocation5 + $0x124] ss:$16 sps:$4 sm:$0xff]   ;;  %v3560_v26 = vld [vmem:[#allocation5 + $0x12c] ss:$16 sps:$4 sm:$0xff]  }
 0x130   :  { %v237_v42 = vadd.f32 %v236_v36, %v4017_v38  ;;  %v238_v43 = vpop.f32.mrb[13].mxu0  ;;  %1859 = vmatprep.subr.bf16.mxu1 %v3527_v29  ;;  %2085 = vmatprep.subr.bf16.mxu0 %v3530_v30  ;;  %v3555_v31 = vld [vmem:[#allocation5 + $0x120] ss:$16 sps:$4 sm:$0xff]  }
 0x131   :  { %v239_v46 = vadd.f32 %v238_v43, %v4020_v39  ;;  %v240_v47 = vpop.f32.mrb[14].mxu0  ;;  %791 = vmatprep.mubr.bf16.mxu1 %v322_v33  ;;  %904 = vmatprep.mubr.bf16.mxu0 %v322_v33 }
 0x132   :  { %v241_v48 = vadd.f32 %v240_v47, %v4017_v38  ;;  %v242_v49 = vpop.f32.mrb[15].mxu0  ;;  %792 = vmatmul.mubr.bf16.gmra.mrb[8].mxu1 %v321_v32  ;;  %905 = vmatmul.mubr.bf16.gmra.mrb[40].mxu0 %v321_v32  ;;  %v297_v53 = vmax.f32 %v237_v42, 0.0  ;;  %v3558_v32 = vld [vmem:[#allocation5 + $0x128] ss:$16 sps:$4 sm:$0xff]   ;;  %v3561_v47 = vld [vmem:[#allocation5 + $0x140] ss:$16 sps:$4 sm:$0xff]  }
 0x133   :  { %v243_v50 = vadd.f32 %v242_v49, %v4020_v39  ;;  %1860 = vmatpush1.bf16.msra.mxu1 %v3525_v40  ;;  %2086 = vmatpush1.bf16.msra.mxu0 %v3528_v41  ;;  %v298_v57 = vmax.f32 %v239_v46, 0.0  ;;  %v3563_v40 = vld [vmem:[#allocation5 + $0x144] ss:$16 sps:$4 sm:$0xff]   ;;  %v3566_v41 = vld [vmem:[#allocation5 + $0x14c] ss:$16 sps:$4 sm:$0xff]  }
 0x134   :  { %v299_v54 = vmax.f32 %v241_v48, 0.0  ;;  %1861 = vmatprep.subr.bf16.mxu1 %v3533_v44  ;;  %2087 = vmatprep.subr.bf16.mxu0 %v3536_v45  ;;  %v3564_v48 = vld [vmem:[#allocation5 + $0x148] ss:$16 sps:$4 sm:$0xff]  }
 0x135   :  { %v300_v58 = vmax.f32 %v243_v50, 0.0 }
 0x136   :  { %v323_v59 = vpack.c.bf16 %v299_v54, %v297_v53 }
 0x137   :  { %v324_v60 = vpack.c.bf16 %v300_v58, %v298_v57  ;;  %v246_v61 = vpop.f32.mrb[16].mxu0  ;;  %1862 = vmatpush1.bf16.msra.mxu1 %v3531_v51  ;;  %2088 = vmatpush1.bf16.msra.mxu0 %v3534_v52  ;;  %v3569_v51 = vld [vmem:[#allocation5 + $0x164] ss:$16 sps:$4 sm:$0xff]   ;;  %v3572_v52 = vld [vmem:[#allocation5 + $0x16c] ss:$16 sps:$4 sm:$0xff]  }
 0x138   :  { %v247_v1 = vadd.f32 %v246_v61, %v4017_v38  ;;  %v248_v2 = vpop.f32.mrb[17].mxu0  ;;  %1863 = vmatprep.subr.bf16.mxu1 %v3539_v55  ;;  %2089 = vmatprep.subr.bf16.mxu0 %v3542_v56  ;;  %v3567_v58 = vld [vmem:[#allocation5 + $0x160] ss:$16 sps:$4 sm:$0xff]  }
 0x139   :  { %v249_v5 = vadd.f32 %v248_v2, %v4020_v39  ;;  %v250_v6 = vpop.f32.mrb[18].mxu0  ;;  %801 = vmatprep.mubr.bf16.mxu1 %v324_v60  ;;  %914 = vmatprep.mubr.bf16.mxu0 %v324_v60 }
 0x13a   :  { %v251_v7 = vadd.f32 %v250_v6, %v4017_v38  ;;  %v252_v8 = vpop.f32.mrb[19].mxu0  ;;  %802 = vmatmul.mubr.bf16.gmra.mrb[12].mxu1 %v323_v59  ;;  %915 = vmatmul.mubr.bf16.gmra.mrb[44].mxu0 %v323_v59  ;;  %v301_v12 = vmax.f32 %v247_v1, 0.0  ;;  %v3570_v59 = vld [vmem:[#allocation5 + $0x168] ss:$16 sps:$4 sm:$0xff]   ;;  %v3573_v6 = vld [vmem:[#allocation5 + $0x180] ss:$16 sps:$4 sm:$0xff]  }
 0x13b   :  { %v253_v9 = vadd.f32 %v252_v8, %v4020_v39  ;;  %1864 = vmatpush1.bf16.msra.mxu1 %v3537_v62  ;;  %2090 = vmatpush1.bf16.msra.mxu0 %v3540_v63  ;;  %v302_v16 = vmax.f32 %v249_v5, 0.0  ;;  %v3575_v62 = vld [vmem:[#allocation5 + $0x184] ss:$16 sps:$4 sm:$0xff]   ;;  %v3578_v63 = vld [vmem:[#allocation5 + $0x18c] ss:$16 sps:$4 sm:$0xff]  }
 0x13c   :  { %v303_v13 = vmax.f32 %v251_v7, 0.0  ;;  %1865 = vmatprep.subr.bf16.mxu1 %v3545_v3  ;;  %2091 = vmatprep.subr.bf16.mxu0 %v3548_v4  ;;  %v3576_v7 = vld [vmem:[#allocation5 + $0x188] ss:$16 sps:$4 sm:$0xff]  }
 0x13d   :  { %v304_v17 = vmax.f32 %v253_v9, 0.0 }
 0x13e   :  { %v325_v18 = vpack.c.bf16 %v303_v13, %v301_v12 }
 0x13f   :  { %v326_v19 = vpack.c.bf16 %v304_v17, %v302_v16  ;;  %v256_v20 = vpop.f32.mrb[20].mxu0  ;;  %1866 = vmatpush1.bf16.msra.mxu1 %v3543_v10  ;;  %2092 = vmatpush1.bf16.msra.mxu0 %v3546_v11  ;;  %v3581_v10 = vld [vmem:[#allocation5 + $0x1a4] ss:$16 sps:$4 sm:$0xff]   ;;  %v3584_v11 = vld [vmem:[#allocation5 + $0x1ac] ss:$16 sps:$4 sm:$0xff]  }
 0x140   :  { %v257_v23 = vadd.f32 %v256_v20, %v4017_v38  ;;  %v258_v24 = vpop.f32.mrb[21].mxu0  ;;  %1867 = vmatprep.subr.bf16.mxu1 %v3551_v14  ;;  %2093 = vmatprep.subr.bf16.mxu0 %v3554_v15  ;;  %v3579_v17 = vld [vmem:[#allocation5 + $0x1a0] ss:$16 sps:$4 sm:$0xff]  }
 0x141   :  { %v259_v27 = vadd.f32 %v258_v24, %v4020_v39  ;;  %v260_v28 = vpop.f32.mrb[22].mxu0  ;;  %811 = vmatprep.mubr.bf16.mxu1 %v326_v19  ;;  %924 = vmatprep.mubr.bf16.mxu0 %v326_v19 }
 0x142   :  { %v261_v29 = vadd.f32 %v260_v28, %v4017_v38  ;;  %v262_v30 = vpop.f32.mrb[23].mxu0  ;;  %812 = vmatmul.mubr.bf16.gmra.mrb[16].mxu1 %v325_v18  ;;  %925 = vmatmul.mubr.bf16.gmra.mrb[48].mxu0 %v325_v18  ;;  %v305_v33 = vmax.f32 %v257_v23, 0.0  ;;  %v3582_v18 = vld [vmem:[#allocation5 + $0x1a8] ss:$16 sps:$4 sm:$0xff]   ;;  %v3596_v28 = vld [vmem:[#allocation5 + $0x1ec] ss:$16 sps:$4 sm:$0xff]  }
 0x143   :  { %v263_v0 = vadd.f32 %v262_v30, %v4020_v39  ;;  %1868 = vmatpush1.bf16.msra.mxu1 %v3549_v21  ;;  %2094 = vmatpush1.bf16.msra.mxu0 %v3552_v22  ;;  %v306_v42 = vmax.f32 %v259_v27, 0.0  ;;  %v3593_v27 = vld [vmem:[#allocation5 + $0x1e4] ss:$16 sps:$4 sm:$0xff]   ;;  %v3594_v30 = vld [vmem:[#allocation5 + $0x1e8] ss:$16 sps:$4 sm:$0xff]  }
 0x144   :  { %v307_v36 = vmax.f32 %v261_v29, 0.0  ;;  %1869 = vmatprep.subr.bf16.mxu1 %v3557_v25  ;;  %2095 = vmatprep.subr.bf16.mxu0 %v3560_v26  ;;  %v3585_v25 = vld [vmem:[#allocation5 + $0x1c0] ss:$16 sps:$4 sm:$0xff]   ;;  %v3588_v26 = vld [vmem:[#allocation5 + $0x1c8] ss:$16 sps:$4 sm:$0xff]  }
 0x145   :  { %v308_v43 = vmax.f32 %v263_v0, 0.0  ;;  %v3591_v29 = vld [vmem:[#allocation5 + $0x1e0] ss:$16 sps:$4 sm:$0xff]   ;;  %v3599_v0 = vld [vmem:[#allocation5 + $0x204] ss:$16 sps:$4 sm:$0xff]  }
 0x146   :  { %v327_v44 = vpack.c.bf16 %v307_v36, %v305_v33  ;;  %v397_v33 = vld [vmem:[%s4319_s4] sm:$0xf]  ;;  %v413_v36 = vsub.s32 3, %v4005_v34 }
 0x147   :  { %v328_v45 = vpack.c.bf16 %v308_v43, %v306_v42  ;;  %v266_v46 = vpop.f32.mrb[24].mxu0  ;;  %1870 = vmatpush1.bf16.msra.mxu1 %v3555_v31  ;;  %2096 = vmatpush1.bf16.msra.mxu0 %v3558_v32  ;;  %v3602_v31 = vld [vmem:[#allocation5 + $0x20c] ss:$16 sps:$4 sm:$0xff]   ;;  %v409_v32 = vsub.s32 2, %v4005_v34  ;;  %v4067_v42 = vrot.slane %v397_v33, %v4014_v37 }
 0x148   :  { %v267_v49 = vadd.f32 %v266_v46, %v4017_v38  ;;  %v268_v50 = vpop.f32.mrb[25].mxu0  ;;  %1871 = vmatprep.subr.bf16.mxu1 %v3563_v40  ;;  %2097 = vmatprep.subr.bf16.mxu0 %v3566_v41  ;;  %v4060_v40 = vrot.slane %v397_v33, %v4008_v35  ;;  %v4071_v43 = vrot.slane %v397_v33, %v413_v36 }
 0x149   :  { %v269_v53 = vadd.f32 %v268_v50, %v4020_v39  ;;  %v270_v54 = vpop.f32.mrb[26].mxu0  ;;  %821 = vmatprep.mubr.bf16.mxu1 %v328_v45  ;;  %934 = vmatprep.mubr.bf16.mxu0 %v328_v45  ;;  %v4064_v41 = vrot.slane %v397_v33, %v409_v32 }
 0x14a   :  { %v271_v55 = vadd.f32 %v270_v54, %v4017_v38  ;;  %v272_v56 = vpop.f32.mrb[27].mxu0  ;;  %822 = vmatmul.mubr.bf16.gmra.mrb[20].mxu1 %v327_v44  ;;  %935 = vmatmul.mubr.bf16.gmra.mrb[52].mxu0 %v327_v44  ;;  %v309_v60 = vmax.f32 %v267_v49, 0.0 }
 0x14b   :  { %v273_v57 = vadd.f32 %v272_v56, %v4020_v39  ;;  %1872 = vmatpush1.bf16.msra.mxu1 %v3561_v47  ;;  %2098 = vmatpush1.bf16.msra.mxu0 %v3564_v48  ;;  %v310_v1 = vmax.f32 %v269_v53, 0.0 }
 0x14c   :  { %v311_v61 = vmax.f32 %v271_v55, 0.0  ;;  %1873 = vmatprep.subr.bf16.mxu1 %v3569_v51  ;;  %2099 = vmatprep.subr.bf16.mxu0 %v3572_v52 }
 0x14d   :  { %v312_v2 = vmax.f32 %v273_v57, 0.0 }
 0x14e   :  { %v329_v3 = vpack.c.bf16 %v311_v61, %v309_v60 }
 0x14f   :  { %v330_v4 = vpack.c.bf16 %v312_v2, %v310_v1  ;;  %v276_v5 = vpop.f32.mrb[28].mxu0  ;;  %1874 = vmatpush1.bf16.msra.mxu1 %v3567_v58  ;;  %2100 = vmatpush1.bf16.msra.mxu0 %v3570_v59 }
 0x150   :  { %v277_v8 = vadd.f32 %v276_v5, %v4017_v38  ;;  %v278_v9 = vpop.f32.mrb[29].mxu0  ;;  %1875 = vmatprep.subr.bf16.mxu1 %v3575_v62  ;;  %2101 = vmatprep.subr.bf16.mxu0 %v3578_v63 }
 0x151   :  { %v279_v12 = vadd.f32 %v278_v9, %v4020_v39  ;;  %v280_v13 = vpop.f32.mrb[30].mxu0  ;;  %831 = vmatprep.mubr.bf16.mxu1 %v330_v4  ;;  %944 = vmatprep.mubr.bf16.mxu0 %v330_v4 }
 0x152   :  { %v281_v14 = vadd.f32 %v280_v13, %v4017_v38  ;;  %v282_v15 = vpop.f32.mrb[31].mxu0  ;;  %832 = vmatmul.mubr.bf16.gmra.mrb[24].mxu1 %v329_v3  ;;  %945 = vmatmul.mubr.bf16.gmra.mrb[56].mxu0 %v329_v3  ;;  %v313_v19 = vmax.f32 %v277_v8, 0.0  ;;  %v3587_v38 = vld [vmem:[#allocation5 + $0x1c4] ss:$16 sps:$4 sm:$0xff]  }
 0x153   :  { %v283_v16 = vadd.f32 %v282_v15, %v4020_v39  ;;  %1876 = vmatpush1.bf16.msra.mxu1 %v3573_v6  ;;  %2102 = vmatpush1.bf16.msra.mxu0 %v3576_v7  ;;  %v314_v21 = vmax.f32 %v279_v12, 0.0  ;;  %v3590_v39 = vld [vmem:[#allocation5 + $0x1cc] ss:$16 sps:$4 sm:$0xff]   ;;  %v3600_v12 = vld [vmem:[#allocation5 + $0x208] ss:$16 sps:$4 sm:$0xff]  }
 0x154   :  { %v315_v20 = vmax.f32 %v281_v14, 0.0  ;;  %1877 = vmatprep.subr.bf16.mxu1 %v3581_v10  ;;  %2103 = vmatprep.subr.bf16.mxu0 %v3584_v11  ;;  %v3597_v11 = vld [vmem:[#allocation5 + $0x200] ss:$16 sps:$4 sm:$0xff]  }
 0x155   :  { %v316_v22 = vmax.f32 %v283_v16, 0.0 }
 0x156   :  { %v331_v23 = vpack.c.bf16 %v315_v20, %v313_v19 }
 0x157   :  { %v332_v24 = vpack.c.bf16 %v316_v22, %v314_v21  ;;  %1878 = vmatpush1.bf16.msra.mxu1 %v3579_v17  ;;  %2104 = vmatpush1.bf16.msra.mxu0 %v3582_v18  ;;  %v3605_v17 = vld [vmem:[#allocation5 + $0x224] ss:$16 sps:$4 sm:$0xff]   ;;  %v3608_v18 = vld [vmem:[#allocation5 + $0x22c] ss:$16 sps:$4 sm:$0xff]  }
 0x158   :  { %1879 = vmatprep.subr.bf16.mxu1 %v3587_v38  ;;  %2105 = vmatprep.subr.bf16.mxu0 %v3590_v39 }
 0x159   :  { %841 = vmatprep.mubr.bf16.mxu1 %v332_v24  ;;  %954 = vmatprep.mubr.bf16.mxu0 %v332_v24 }
 0x15a   :  { %842 = vmatmul.mubr.bf16.gmra.mrb[28].mxu1 %v331_v23  ;;  %955 = vmatmul.mubr.bf16.gmra.mrb[60].mxu0 %v331_v23 }
 0x15b   :  { %1880 = vmatpush1.bf16.msra.mxu1 %v3585_v25  ;;  %2106 = vmatpush1.bf16.msra.mxu0 %v3588_v26 }
 0x15c   :  { %1881 = vmatprep.subr.bf16.mxu1 %v3593_v27  ;;  %2107 = vmatprep.subr.bf16.mxu0 %v3596_v28  ;;  %v3603_v27 = vld [vmem:[#allocation5 + $0x220] ss:$16 sps:$4 sm:$0xff]   ;;  %v3606_v28 = vld [vmem:[#allocation5 + $0x228] ss:$16 sps:$4 sm:$0xff]  }
 0x15f   :  { %1882 = vmatpush1.bf16.msra.mxu1 %v3591_v29  ;;  %2108 = vmatpush1.bf16.msra.mxu0 %v3594_v30  ;;  %v3611_v29 = vld [vmem:[#allocation5 + $0x244] ss:$16 sps:$4 sm:$0xff]  }
 0x160   :  { %1964 = vmatprep.subr.bf16.mxu1 %v3599_v0  ;;  %2190 = vmatprep.subr.bf16.mxu0 %v3602_v31 }
 0x1f5   :  { %v773_v44 = vpop.f32.mrb[0].mxu1  ;;  %v886_v45 = vpop.f32.mrb[32].mxu0 }
 0x1f6   :  { %v774_v46 = vadd.f32 %v773_v44, %v4060_v40  ;;  %v887_v47 = vadd.f32 %v886_v45, %v4064_v41  ;;  %v775_v48 = vpop.f32.mrb[1].mxu1  ;;  %v888_v49 = vpop.f32.mrb[33].mxu0  ;;  %v3614_v44 = vld [vmem:[#allocation5 + $0x24c] ss:$16 sps:$4 sm:$0xff]  }
 0x1f7   :  { %v776_v50 = vadd.f32 %v775_v48, %v4067_v42  ;;  %v889_v51 = vadd.f32 %v888_v49, %v4071_v43  ;;  %v777_v52 = vpop.f32.mrb[2].mxu1  ;;  %v890_v53 = vpop.f32.mrb[34].mxu0 }
 0x1f8   :  { %v778_v54 = vadd.f32 %v777_v52, %v4060_v40  ;;  %v891_v55 = vadd.f32 %v890_v53, %v4064_v41  ;;  %v779_v56 = vpop.f32.mrb[3].mxu1  ;;  %v892_v57 = vpop.f32.mrb[35].mxu0  ;;  %v965_v60 = vmax.f32 %v774_v46, 0.0  ;;  %v967_v61 = vmax.f32 %v887_v47, 0.0 }
 0x1f9   :  { %v780_v58 = vadd.f32 %v779_v56, %v4067_v42  ;;  %v893_v59 = vadd.f32 %v892_v57, %v4071_v43  ;;  %v966_v1 = vmax.f32 %v776_v50, 0.0  ;;  %v968_v2 = vmax.f32 %v889_v51, 0.0  ;;  %v3612_v56 = vld [vmem:[#allocation5 + $0x248] ss:$16 sps:$4 sm:$0xff]  }
 0x1fa   :  { %v969_v62 = vmax.f32 %v778_v54, 0.0  ;;  %v971_v63 = vmax.f32 %v891_v55, 0.0  ;;  %v3609_v55 = vld [vmem:[#allocation5 + $0x240] ss:$16 sps:$4 sm:$0xff]  }
 0x1fb   :  { %v970_v3 = vmax.f32 %v780_v58, 0.0  ;;  %v972_v4 = vmax.f32 %v893_v59, 0.0 }
 0x1fc   :  { %v1029_v5 = vpack.c.bf16 %v969_v62, %v965_v60  ;;  %v4081_v6 = vpack.c.bf16 %v971_v63, %v967_v61  ;;  %v3617_v61 = vld [vmem:[#allocation5 + $0x264] ss:$16 sps:$4 sm:$0xff]   ;;  %v3620_v62 = vld [vmem:[#allocation5 + $0x26c] ss:$16 sps:$4 sm:$0xff]  }
 0x1fd   :  { %v1030_v7 = vpack.c.bf16 %v970_v3, %v966_v1  ;;  %v4083_v8 = vpack.c.bf16 %v972_v4, %v968_v2  ;;  %v783_v9 = vpop.f32.mrb[4].mxu1  ;;  %v896_v10 = vpop.f32.mrb[36].mxu0 }
 0x1fe   :  { %v784_v13 = vadd.f32 %v783_v9, %v4060_v40  ;;  %v897_v14 = vadd.f32 %v896_v10, %v4064_v41  ;;  %v785_v15 = vpop.f32.mrb[5].mxu1  ;;  %v898_v16 = vpop.f32.mrb[37].mxu0 }
 0x1ff   :  { %v786_v19 = vadd.f32 %v785_v15, %v4067_v42  ;;  %v899_v20 = vadd.f32 %v898_v16, %v4071_v43  ;;  %v787_v21 = vpop.f32.mrb[6].mxu1  ;;  %v900_v22 = vpop.f32.mrb[38].mxu0  ;;  %1883 = vmatprep.mubr.bf16.mxu1 %v1030_v7  ;;  %2109 = vmatprep.mubr.bf16.mxu0 %v1030_v7 }
 0x200   :  { %v788_v23 = vadd.f32 %v787_v21, %v4060_v40  ;;  %v901_v24 = vadd.f32 %v900_v22, %v4064_v41  ;;  %v789_v38 = vpop.f32.mrb[7].mxu1  ;;  %v902_v39 = vpop.f32.mrb[39].mxu0  ;;  %1884 = vmatmul.mubr.bf16.vlgmr.msra.gmra.mrb[32].mxu1 %v1029_v5  ;;  %2110 = vmatmul.mubr.bf16.vlgmr.msra.gmra.mrb[64].mxu0 %v1029_v5  ;;  %v973_v30 = vmax.f32 %v784_v13, 0.0  ;;  %v975_v0 = vmax.f32 %v897_v14, 0.0  ;;  %v3618_v13 = vld [vmem:[#allocation5 + $0x268] ss:$16 sps:$4 sm:$0xff]  }
 0x201   :  { %v790_v25 = vadd.f32 %v789_v38, %v4067_v42  ;;  %v903_v26 = vadd.f32 %v902_v39, %v4071_v43  ;;  %1965 = vmatpush1.bf16.msra.mxu1 %v3597_v11  ;;  %2191 = vmatpush1.bf16.msra.mxu0 %v3600_v12  ;;  %v974_v45 = vmax.f32 %v786_v19, 0.0  ;;  %v976_v46 = vmax.f32 %v899_v20, 0.0  ;;  %v3615_v12 = vld [vmem:[#allocation5 + $0x260] ss:$16 sps:$4 sm:$0xff]   ;;  %v3623_v14 = vld [vmem:[#allocation5 + $0x284] ss:$16 sps:$4 sm:$0xff]  }
 0x202   :  { %v977_v31 = vmax.f32 %v788_v23, 0.0  ;;  %v979_v33 = vmax.f32 %v901_v24, 0.0  ;;  %1966 = vmatprep.subr.bf16.mxu1 %v3605_v17  ;;  %2192 = vmatprep.subr.bf16.mxu0 %v3608_v18  ;;  %v3626_v19 = vld [vmem:[#allocation5 + $0x28c] ss:$16 sps:$4 sm:$0xff]  }
 0x203   :  { %v978_v47 = vmax.f32 %v790_v25, 0.0  ;;  %v980_v48 = vmax.f32 %v903_v26, 0.0 }
 0x204   :  { %v1033_v49 = vpack.c.bf16 %v977_v31, %v973_v30  ;;  %v4093_v50 = vpack.c.bf16 %v979_v33, %v975_v0 }
 0x205   :  { %v1034_v51 = vpack.c.bf16 %v978_v47, %v974_v45  ;;  %v4095_v52 = vpack.c.bf16 %v980_v48, %v976_v46  ;;  %1967 = vmatpush1.bf16.msra.mxu1 %v3603_v27  ;;  %v793_v53 = vpop.f32.mrb[8].mxu1  ;;  %v906_v54 = vpop.f32.mrb[40].mxu0  ;;  %2193 = vmatpush1.bf16.msra.mxu0 %v3606_v28  ;;  %v3621_v28 = vld [vmem:[#allocation5 + $0x280] ss:$16 sps:$4 sm:$0xff]   ;;  %v3632_v45 = vld [vmem:[#allocation5 + $0x2ac] ss:$16 sps:$4 sm:$0xff]  }
 0x206   :  { %v794_v57 = vadd.f32 %v793_v53, %v4060_v40  ;;  %v907_v58 = vadd.f32 %v906_v54, %v4064_v41  ;;  %v795_v59 = vpop.f32.mrb[9].mxu1  ;;  %v908_v60 = vpop.f32.mrb[41].mxu0  ;;  %1968 = vmatprep.subr.bf16.mxu1 %v3611_v29  ;;  %2194 = vmatprep.subr.bf16.mxu0 %v3614_v44  ;;  %v3624_v29 = vld [vmem:[#allocation5 + $0x288] ss:$16 sps:$4 sm:$0xff]   ;;  %v3629_v44 = vld [vmem:[#allocation5 + $0x2a4] ss:$16 sps:$4 sm:$0xff]  }
 0x207   :  { %v796_v63 = vadd.f32 %v795_v59, %v4067_v42  ;;  %v909_v1 = vadd.f32 %v908_v60, %v4071_v43  ;;  %v797_v2 = vpop.f32.mrb[10].mxu1  ;;  %v910_v3 = vpop.f32.mrb[42].mxu0  ;;  %1893 = vmatprep.mubr.bf16.mxu1 %v1034_v51  ;;  %2119 = vmatprep.mubr.bf16.mxu0 %v1034_v51  ;;  %v3630_v59 = vld [vmem:[#allocation5 + $0x2a8] ss:$16 sps:$4 sm:$0xff]   ;;  %v3635_v60 = vld [vmem:[#allocation5 + $0x2c4] ss:$16 sps:$4 sm:$0xff]  }
 0x208   :  { %v798_v4 = vadd.f32 %v797_v2, %v4060_v40  ;;  %v911_v5 = vadd.f32 %v910_v3, %v4064_v41  ;;  %v799_v7 = vpop.f32.mrb[11].mxu1  ;;  %v912_v9 = vpop.f32.mrb[43].mxu0  ;;  %1894 = vmatmul.mubr.bf16.gmra.mrb[36].mxu1 %v1033_v49  ;;  %2120 = vmatmul.mubr.bf16.gmra.mrb[68].mxu0 %v1033_v49  ;;  %v981_v15 = vmax.f32 %v794_v57, 0.0  ;;  %v983_v16 = vmax.f32 %v907_v58, 0.0  ;;  %v3627_v58 = vld [vmem:[#allocation5 + $0x2a0] ss:$16 sps:$4 sm:$0xff]  }
 0x209   :  { %v800_v10 = vadd.f32 %v799_v7, %v4067_v42  ;;  %v913_v11 = vadd.f32 %v912_v9, %v4071_v43  ;;  %1969 = vmatpush1.bf16.msra.mxu1 %v3609_v55  ;;  %2195 = vmatpush1.bf16.msra.mxu0 %v3612_v56  ;;  %v982_v20 = vmax.f32 %v796_v63, 0.0  ;;  %v984_v21 = vmax.f32 %v909_v1, 0.0  ;;  %v3638_v2 = vld [vmem:[#allocation5 + $0x2cc] ss:$16 sps:$4 sm:$0xff]  }
 0x20a   :  { %v985_v17 = vmax.f32 %v798_v4, 0.0  ;;  %v987_v18 = vmax.f32 %v911_v5, 0.0  ;;  %1970 = vmatprep.subr.bf16.mxu1 %v3617_v61  ;;  %2196 = vmatprep.subr.bf16.mxu0 %v3620_v62 }
 0x20b   :  { %v986_v22 = vmax.f32 %v800_v10, 0.0  ;;  %v988_v23 = vmax.f32 %v913_v11, 0.0 }
 0x20c   :  { %v1037_v24 = vpack.c.bf16 %v985_v17, %v981_v15  ;;  %v4105_v38 = vpack.c.bf16 %v987_v18, %v983_v16  ;;  %v3633_v15 = vld [vmem:[#allocation5 + $0x2c0] ss:$16 sps:$4 sm:$0xff]   ;;  %v3636_v16 = vld [vmem:[#allocation5 + $0x2c8] ss:$16 sps:$4 sm:$0xff]  }
 0x20d   :  { %v1038_v39 = vpack.c.bf16 %v986_v22, %v982_v20  ;;  %v4107_v25 = vpack.c.bf16 %v988_v23, %v984_v21  ;;  %1971 = vmatpush1.bf16.msra.mxu1 %v3615_v12  ;;  %v803_v26 = vpop.f32.mrb[12].mxu1  ;;  %v916_v27 = vpop.f32.mrb[44].mxu0  ;;  %2197 = vmatpush1.bf16.msra.mxu0 %v3618_v13  ;;  %v3641_v21 = vld [vmem:[#allocation5 + $0x2e4] ss:$16 sps:$4 sm:$0xff]   ;;  %v3644_v22 = vld [vmem:[#allocation5 + $0x2ec] ss:$16 sps:$4 sm:$0xff]  }
 0x20e   :  { %v804_v30 = vadd.f32 %v803_v26, %v4060_v40  ;;  %v917_v0 = vadd.f32 %v916_v27, %v4064_v41  ;;  %v805_v31 = vpop.f32.mrb[13].mxu1  ;;  %v918_v33 = vpop.f32.mrb[45].mxu0  ;;  %1972 = vmatprep.subr.bf16.mxu1 %v3623_v14  ;;  %2198 = vmatprep.subr.bf16.mxu0 %v3626_v19 }
 0x20f   :  { %v806_v46 = vadd.f32 %v805_v31, %v4067_v42  ;;  %v919_v47 = vadd.f32 %v918_v33, %v4071_v43  ;;  %v807_v48 = vpop.f32.mrb[14].mxu1  ;;  %v920_v49 = vpop.f32.mrb[46].mxu0  ;;  %1903 = vmatprep.mubr.bf16.mxu1 %v1038_v39  ;;  %2129 = vmatprep.mubr.bf16.mxu0 %v1038_v39  ;;  %v3639_v33 = vld [vmem:[#allocation5 + $0x2e0] ss:$16 sps:$4 sm:$0xff]  }
 0x210   :  { %v808_v51 = vadd.f32 %v807_v48, %v4060_v40  ;;  %v921_v53 = vadd.f32 %v920_v49, %v4064_v41  ;;  %v809_v54 = vpop.f32.mrb[15].mxu1  ;;  %v922_v55 = vpop.f32.mrb[47].mxu0  ;;  %1904 = vmatmul.mubr.bf16.gmra.mrb[40].mxu1 %v1037_v24  ;;  %2130 = vmatmul.mubr.bf16.gmra.mrb[72].mxu0 %v1037_v24  ;;  %v989_v61 = vmax.f32 %v804_v30, 0.0  ;;  %v991_v62 = vmax.f32 %v917_v0, 0.0 }
 0x211   :  { %v810_v56 = vadd.f32 %v809_v54, %v4067_v42  ;;  %v923_v57 = vadd.f32 %v922_v55, %v4071_v43  ;;  %1973 = vmatpush1.bf16.msra.mxu1 %v3621_v28  ;;  %2199 = vmatpush1.bf16.msra.mxu0 %v3624_v29  ;;  %v990_v3 = vmax.f32 %v806_v46, 0.0  ;;  %v992_v4 = vmax.f32 %v919_v47, 0.0 }
 0x212   :  { %v993_v63 = vmax.f32 %v808_v51, 0.0  ;;  %v995_v1 = vmax.f32 %v921_v53, 0.0  ;;  %1974 = vmatprep.subr.bf16.mxu1 %v3629_v44  ;;  %2200 = vmatprep.subr.bf16.mxu0 %v3632_v45  ;;  %v3642_v44 = vld [vmem:[#allocation5 + $0x2e8] ss:$16 sps:$4 sm:$0xff]   ;;  %v3647_v45 = vld [vmem:[#allocation5 + $0x304] ss:$16 sps:$4 sm:$0xff]  }
 0x213   :  { %v994_v5 = vmax.f32 %v810_v56, 0.0  ;;  %v996_v7 = vmax.f32 %v923_v57, 0.0  ;;  %v3650_v51 = vld [vmem:[#allocation5 + $0x30c] ss:$16 sps:$4 sm:$0xff]  }
 0x214   :  { %v1041_v9 = vpack.c.bf16 %v993_v63, %v989_v61  ;;  %v4117_v10 = vpack.c.bf16 %v995_v1, %v991_v62  ;;  %v3645_v63 = vld [vmem:[#allocation5 + $0x300] ss:$16 sps:$4 sm:$0xff]   ;;  %v3648_v1 = vld [vmem:[#allocation5 + $0x308] ss:$16 sps:$4 sm:$0xff]  }
 0x215   :  { %v1042_v11 = vpack.c.bf16 %v994_v5, %v990_v3  ;;  %v4119_v12 = vpack.c.bf16 %v996_v7, %v992_v4  ;;  %1975 = vmatpush1.bf16.msra.mxu1 %v3627_v58  ;;  %v813_v13 = vpop.f32.mrb[16].mxu1  ;;  %v926_v14 = vpop.f32.mrb[48].mxu0  ;;  %2201 = vmatpush1.bf16.msra.mxu0 %v3630_v59  ;;  %v3653_v7 = vld [vmem:[#allocation5 + $0x324] ss:$16 sps:$4 sm:$0xff]  }
 0x216   :  { %v814_v17 = vadd.f32 %v813_v13, %v4060_v40  ;;  %v927_v18 = vadd.f32 %v926_v14, %v4064_v41  ;;  %v815_v19 = vpop.f32.mrb[17].mxu1  ;;  %v928_v20 = vpop.f32.mrb[49].mxu0  ;;  %1976 = vmatprep.subr.bf16.mxu1 %v3635_v60  ;;  %2202 = vmatprep.subr.bf16.mxu0 %v3638_v2 }
 0x217   :  { %v816_v23 = vadd.f32 %v815_v19, %v4067_v42  ;;  %v929_v24 = vadd.f32 %v928_v20, %v4071_v43  ;;  %v817_v39 = vpop.f32.mrb[18].mxu1  ;;  %v930_v26 = vpop.f32.mrb[50].mxu0  ;;  %1913 = vmatprep.mubr.bf16.mxu1 %v1042_v11  ;;  %2139 = vmatprep.mubr.bf16.mxu0 %v1042_v11 }
 0x218   :  { %v818_v27 = vadd.f32 %v817_v39, %v4060_v40  ;;  %v931_v28 = vadd.f32 %v930_v26, %v4064_v41  ;;  %v819_v29 = vpop.f32.mrb[19].mxu1  ;;  %v932_v30 = vpop.f32.mrb[51].mxu0  ;;  %1914 = vmatmul.mubr.bf16.gmra.mrb[44].mxu1 %v1041_v9  ;;  %2140 = vmatmul.mubr.bf16.gmra.mrb[76].mxu0 %v1041_v9  ;;  %v997_v46 = vmax.f32 %v814_v17, 0.0  ;;  %v999_v47 = vmax.f32 %v927_v18, 0.0  ;;  %v3656_v9 = vld [vmem:[#allocation5 + $0x32c] ss:$16 sps:$4 sm:$0xff]  }
 0x219   :  { %v820_v0 = vadd.f32 %v819_v29, %v4067_v42  ;;  %v933_v31 = vadd.f32 %v932_v30, %v4071_v43  ;;  %1977 = vmatpush1.bf16.msra.mxu1 %v3633_v15  ;;  %2203 = vmatpush1.bf16.msra.mxu0 %v3636_v16  ;;  %v998_v53 = vmax.f32 %v816_v23, 0.0  ;;  %v1000_v54 = vmax.f32 %v929_v24, 0.0  ;;  %v3654_v23 = vld [vmem:[#allocation5 + $0x328] ss:$16 sps:$4 sm:$0xff]   ;;  %v3659_v24 = vld [vmem:[#allocation5 + $0x344] ss:$16 sps:$4 sm:$0xff]  }
 0x21a   :  { %v1001_v48 = vmax.f32 %v818_v27, 0.0  ;;  %v1003_v49 = vmax.f32 %v931_v28, 0.0  ;;  %1978 = vmatprep.subr.bf16.mxu1 %v3641_v21  ;;  %2204 = vmatprep.subr.bf16.mxu0 %v3644_v22  ;;  %v3651_v22 = vld [vmem:[#allocation5 + $0x320] ss:$16 sps:$4 sm:$0xff]   ;;  %v3662_v29 = vld [vmem:[#allocation5 + $0x34c] ss:$16 sps:$4 sm:$0xff]  }
 0x21b   :  { %v1002_v55 = vmax.f32 %v820_v0, 0.0  ;;  %v1004_v56 = vmax.f32 %v933_v31, 0.0 }
 0x21c   :  { %v1045_v57 = vpack.c.bf16 %v1001_v48, %v997_v46  ;;  %v4129_v58 = vpack.c.bf16 %v1003_v49, %v999_v47 }
 0x21d   :  { %v1046_v59 = vpack.c.bf16 %v1002_v55, %v998_v53  ;;  %v4131_v60 = vpack.c.bf16 %v1004_v56, %v1000_v54  ;;  %1979 = vmatpush1.bf16.msra.mxu1 %v3639_v33  ;;  %v823_v61 = vpop.f32.mrb[20].mxu1  ;;  %v936_v62 = vpop.f32.mrb[52].mxu0  ;;  %2205 = vmatpush1.bf16.msra.mxu0 %v3642_v44  ;;  %v3660_v53 = vld [vmem:[#allocation5 + $0x348] ss:$16 sps:$4 sm:$0xff]  }
 0x21e   :  { %v824_v2 = vadd.f32 %v823_v61, %v4060_v40  ;;  %v937_v3 = vadd.f32 %v936_v62, %v4064_v41  ;;  %v825_v4 = vpop.f32.mrb[21].mxu1  ;;  %v938_v5 = vpop.f32.mrb[53].mxu0  ;;  %1980 = vmatprep.subr.bf16.mxu1 %v3647_v45  ;;  %2206 = vmatprep.subr.bf16.mxu0 %v3650_v51  ;;  %v3657_v51 = vld [vmem:[#allocation5 + $0x340] ss:$16 sps:$4 sm:$0xff]   ;;  %v3668_v61 = vld [vmem:[#allocation5 + $0x36c] ss:$16 sps:$4 sm:$0xff]  }
 0x21f   :  { %v826_v11 = vadd.f32 %v825_v4, %v4067_v42  ;;  %v939_v13 = vadd.f32 %v938_v5, %v4071_v43  ;;  %v827_v14 = vpop.f32.mrb[22].mxu1  ;;  %v940_v15 = vpop.f32.mrb[54].mxu0  ;;  %1923 = vmatprep.mubr.bf16.mxu1 %v1046_v59  ;;  %2149 = vmatprep.mubr.bf16.mxu0 %v1046_v59  ;;  %v3665_v59 = vld [vmem:[#allocation5 + $0x364] ss:$16 sps:$4 sm:$0xff]  }
 0x220   :  { %v828_v16 = vadd.f32 %v827_v14, %v4060_v40  ;;  %v941_v17 = vadd.f32 %v940_v15, %v4064_v41  ;;  %v829_v18 = vpop.f32.mrb[23].mxu1  ;;  %v942_v19 = vpop.f32.mrb[55].mxu0  ;;  %1924 = vmatmul.mubr.bf16.gmra.mrb[48].mxu1 %v1045_v57  ;;  %2150 = vmatmul.mubr.bf16.gmra.mrb[80].mxu0 %v1045_v57  ;;  %v1005_v39 = vmax.f32 %v824_v2, 0.0  ;;  %v1007_v26 = vmax.f32 %v937_v3, 0.0  ;;  %v3666_v14 = vld [vmem:[#allocation5 + $0x368] ss:$16 sps:$4 sm:$0xff]  }
 0x221   :  { %v830_v20 = vadd.f32 %v829_v18, %v4067_v42  ;;  %v943_v21 = vadd.f32 %v942_v19, %v4071_v43  ;;  %1981 = vmatpush1.bf16.msra.mxu1 %v3645_v63  ;;  %2207 = vmatpush1.bf16.msra.mxu0 %v3648_v1  ;;  %v1006_v30 = vmax.f32 %v826_v11, 0.0  ;;  %v1008_v0 = vmax.f32 %v939_v13, 0.0  ;;  %v3663_v13 = vld [vmem:[#allocation5 + $0x360] ss:$16 sps:$4 sm:$0xff]   ;;  %v3671_v15 = vld [vmem:[#allocation5 + $0x384] ss:$16 sps:$4 sm:$0xff]  }
 0x222   :  { %v1009_v27 = vmax.f32 %v828_v16, 0.0  ;;  %v1011_v28 = vmax.f32 %v941_v17, 0.0  ;;  %1982 = vmatprep.subr.bf16.mxu1 %v3653_v7  ;;  %2208 = vmatprep.subr.bf16.mxu0 %v3656_v9 }
 0x223   :  { %v1010_v31 = vmax.f32 %v830_v20, 0.0  ;;  %v1012_v33 = vmax.f32 %v943_v21, 0.0  ;;  %v3674_v20 = vld [vmem:[#allocation5 + $0x38c] ss:$16 sps:$4 sm:$0xff]  }
 0x224   :  { %v1049_v44 = vpack.c.bf16 %v1009_v27, %v1005_v39  ;;  %v4141_v45 = vpack.c.bf16 %v1011_v28, %v1007_v26 }
 0x225   :  { %v1050_v46 = vpack.c.bf16 %v1010_v31, %v1006_v30  ;;  %v4143_v47 = vpack.c.bf16 %v1012_v33, %v1008_v0  ;;  %1983 = vmatpush1.bf16.msra.mxu1 %v3651_v22  ;;  %v833_v48 = vpop.f32.mrb[24].mxu1  ;;  %v946_v49 = vpop.f32.mrb[56].mxu0  ;;  %2209 = vmatpush1.bf16.msra.mxu0 %v3654_v23  ;;  %v3669_v0 = vld [vmem:[#allocation5 + $0x380] ss:$16 sps:$4 sm:$0xff]   ;;  %v3672_v31 = vld [vmem:[#allocation5 + $0x388] ss:$16 sps:$4 sm:$0xff]  }
 0x226   :  { %v834_v54 = vadd.f32 %v833_v48, %v4060_v40  ;;  %v947_v55 = vadd.f32 %v946_v49, %v4064_v41  ;;  %v835_v56 = vpop.f32.mrb[25].mxu1  ;;  %v948_v57 = vpop.f32.mrb[57].mxu0  ;;  %1984 = vmatprep.subr.bf16.mxu1 %v3659_v24  ;;  %2210 = vmatprep.subr.bf16.mxu0 %v3662_v29  ;;  %v3677_v49 = vld [vmem:[#allocation5 + $0x3a4] ss:$16 sps:$4 sm:$0xff]  }
 0x227   :  { %v836_v62 = vadd.f32 %v835_v56, %v4067_v42  ;;  %v949_v63 = vadd.f32 %v948_v57, %v4071_v43  ;;  %v837_v1 = vpop.f32.mrb[26].mxu1  ;;  %v950_v2 = vpop.f32.mrb[58].mxu0  ;;  %1933 = vmatprep.mubr.bf16.mxu1 %v1050_v46  ;;  %2159 = vmatprep.mubr.bf16.mxu0 %v1050_v46 }
 0x228   :  { %v838_v3 = vadd.f32 %v837_v1, %v4060_v40  ;;  %v951_v4 = vadd.f32 %v950_v2, %v4064_v41  ;;  %v839_v5 = vpop.f32.mrb[27].mxu1  ;;  %v952_v7 = vpop.f32.mrb[59].mxu0  ;;  %1934 = vmatmul.mubr.bf16.gmra.mrb[52].mxu1 %v1049_v44  ;;  %2160 = vmatmul.mubr.bf16.gmra.mrb[84].mxu0 %v1049_v44  ;;  %v1013_v16 = vmax.f32 %v834_v54, 0.0  ;;  %v1015_v17 = vmax.f32 %v947_v55, 0.0  ;;  %v3675_v2 = vld [vmem:[#allocation5 + $0x3a0] ss:$16 sps:$4 sm:$0xff]  }
 0x229   :  { %v840_v9 = vadd.f32 %v839_v5, %v4067_v42  ;;  %v953_v11 = vadd.f32 %v952_v7, %v4071_v43  ;;  %1985 = vmatpush1.bf16.msra.mxu1 %v3657_v51  ;;  %2211 = vmatpush1.bf16.msra.mxu0 %v3660_v53  ;;  %v1014_v21 = vmax.f32 %v836_v62, 0.0  ;;  %v1016_v22 = vmax.f32 %v949_v63, 0.0  ;;  %v3680_v51 = vld [vmem:[#allocation5 + $0x3ac] ss:$16 sps:$4 sm:$0xff]  }
 0x22a   :  { %v1017_v18 = vmax.f32 %v838_v3, 0.0  ;;  %v1019_v19 = vmax.f32 %v951_v4, 0.0  ;;  %1986 = vmatprep.subr.bf16.mxu1 %v3665_v59  ;;  %2212 = vmatprep.subr.bf16.mxu0 %v3668_v61  ;;  %v3678_v3 = vld [vmem:[#allocation5 + $0x3a8] ss:$16 sps:$4 sm:$0xff]   ;;  %v3683_v4 = vld [vmem:[#allocation5 + $0x3c4] ss:$16 sps:$4 sm:$0xff]  }
 0x22b   :  { %v1018_v23 = vmax.f32 %v840_v9, 0.0  ;;  %v1020_v24 = vmax.f32 %v953_v11, 0.0 }
 0x22c   :  { %v1053_v39 = vpack.c.bf16 %v1017_v18, %v1013_v16  ;;  %v4153_v26 = vpack.c.bf16 %v1019_v19, %v1015_v17  ;;  %v3681_v18 = vld [vmem:[#allocation5 + $0x3c0] ss:$16 sps:$4 sm:$0xff]   ;;  %v3684_v19 = vld [vmem:[#allocation5 + $0x3c8] ss:$16 sps:$4 sm:$0xff]  }
 0x22d   :  { %v1054_v27 = vpack.c.bf16 %v1018_v23, %v1014_v21  ;;  %v4155_v28 = vpack.c.bf16 %v1020_v24, %v1016_v22  ;;  %1987 = vmatpush1.bf16.msra.mxu1 %v3663_v13  ;;  %v843_v29 = vpop.f32.mrb[28].mxu1  ;;  %v956_v30 = vpop.f32.mrb[60].mxu0  ;;  %2213 = vmatpush1.bf16.msra.mxu0 %v3666_v14  ;;  %v3692_v21 = vld [vmem:[#allocation5 + $0x3ec] ss:$16 sps:$4 sm:$0xff]   ;;  %v3687_v22 = vld [vmem:[#allocation5 + $0x3e0] ss:$16 sps:$4 sm:$0xff]  }
 0x22e   :  { %v844_v33 = vadd.f32 %v843_v29, %v4060_v40  ;;  %v957_v44 = vadd.f32 %v956_v30, %v4064_v41  ;;  %v845_v46 = vpop.f32.mrb[29].mxu1  ;;  %v958_v48 = vpop.f32.mrb[61].mxu0  ;;  %1988 = vmatprep.subr.bf16.mxu1 %v3671_v15  ;;  %2214 = vmatprep.subr.bf16.mxu0 %v3674_v20  ;;  %v3689_v20 = vld [vmem:[#allocation5 + $0x3e4] ss:$16 sps:$4 sm:$0xff]   ;;  %v3690_v23 = vld [vmem:[#allocation5 + $0x3e8] ss:$16 sps:$4 sm:$0xff]  }
 0x22f   :  { %v846_v53 = vadd.f32 %v845_v46, %v4067_v42  ;;  %v959_v54 = vadd.f32 %v958_v48, %v4071_v43  ;;  %v847_v55 = vpop.f32.mrb[30].mxu1  ;;  %v960_v56 = vpop.f32.mrb[62].mxu0  ;;  %1943 = vmatprep.mubr.bf16.mxu1 %v1054_v27  ;;  %2169 = vmatprep.mubr.bf16.mxu0 %v1054_v27  ;;  %v3693_v24 = vld [vmem:[#allocation7 + $0x40] sm:$0xff]   ;;  %v3697_v30 = vld [vmem:[#allocation7 + $0x48] sm:$0xff]   ;;  %v3702_v46 = vld [vmem:[#allocation7 + $0x10] sm:$0xff]  }
 0x230   :  { %v848_v57 = vadd.f32 %v847_v55, %v4060_v40  ;;  %v961_v59 = vadd.f32 %v960_v56, %v4064_v41  ;;  %v849_v61 = vpop.f32.mrb[31].mxu1  ;;  %v962_v62 = vpop.f32.mrb[63].mxu0  ;;  %1944 = vmatmul.mubr.bf16.gmra.mrb[56].mxu1 %v1053_v39  ;;  %2170 = vmatmul.mubr.bf16.gmra.mrb[88].mxu0 %v1053_v39  ;;  %v1021_v5 = vmax.f32 %v844_v33, 0.0  ;;  %v1023_v7 = vmax.f32 %v957_v44, 0.0  ;;  %v3686_v40 = vld [vmem:[#allocation5 + $0x3cc] ss:$16 sps:$4 sm:$0xff]  }
 0x231   :  { %v850_v63 = vadd.f32 %v849_v61, %v4067_v42  ;;  %v963_v1 = vadd.f32 %v962_v62, %v4071_v43  ;;  %1989 = vmatpush1.bf16.msra.mxu1 %v3669_v0  ;;  %2215 = vmatpush1.bf16.msra.mxu0 %v3672_v31  ;;  %v1022_v41 = vmax.f32 %v846_v53, 0.0  ;;  %v1024_v13 = vmax.f32 %v959_v54, 0.0  ;;  %v3695_v39 = vld [vmem:[#allocation7 + $0xc0] sm:$0xff]   ;;  %v3699_v0 = vld [vmem:[#allocation7 + $0xc8] sm:$0xff]   ;;  %v3701_v33 = vld [vmem:[#allocation7 + $0x50] sm:$0xff]  }
 0x232   :  { %v1025_v9 = vmax.f32 %v848_v57, 0.0  ;;  %v1027_v11 = vmax.f32 %v961_v59, 0.0  ;;  %1990 = vmatprep.subr.bf16.mxu1 %v3677_v49  ;;  %2216 = vmatprep.subr.bf16.mxu0 %v3680_v51  ;;  %v3694_v27 = vld [vmem:[#allocation7] sm:$0xff]   ;;  %v3700_v31 = vld [vmem:[#allocation7 + $0x88] sm:$0xff]   ;;  %v3703_v44 = vld [vmem:[#allocation7 + $0xd0] sm:$0xff]  }
 0x233   :  { %v1026_v14 = vmax.f32 %v850_v63, 0.0  ;;  %v1028_v15 = vmax.f32 %v963_v1, 0.0  ;;  %v3696_v29 = vld [vmem:[#allocation7 + $0x80] sm:$0xff]   ;;  %v3704_v48 = vld [vmem:[#allocation7 + $0x90] sm:$0xff]   ;;  %v3705_v49 = vld [vmem:[#allocation7 + $0x58] sm:$0xff]  }
 0x234   :  { %v1057_v16 = vpack.c.bf16 %v1025_v9, %v1021_v5  ;;  %v4165_v42 = vpack.c.bf16 %v1027_v11, %v1023_v7  ;;  %v3708_v51 = vld [vmem:[#allocation7 + $0x98] sm:$0xff]   ;;  %v3709_v53 = vld [vmem:[#allocation7 + $0x60] sm:$0xff]   ;;  %v3713_v57 = vld [vmem:[#allocation7 + $0x68] sm:$0xff]  }
 0x235   :  { %v1058_v43 = vpack.c.bf16 %v1026_v14, %v1022_v41  ;;  %v4167_v17 = vpack.c.bf16 %v1028_v15, %v1024_v13  ;;  %1991 = vmatpush1.bf16.msra.mxu1 %v3675_v2  ;;  %2217 = vmatpush1.bf16.msra.mxu0 %v3678_v3  ;;  %v3711_v54 = vld [vmem:[#allocation7 + $0xe0] sm:$0xff]   ;;  %v3716_v59 = vld [vmem:[#allocation7 + $0xa8] sm:$0xff]   ;;  %v3717_v61 = vld [vmem:[#allocation7 + $0x70] sm:$0xff]  }
 0x236   :  { %1992 = vmatprep.subr.bf16.mxu1 %v3683_v4  ;;  %2218 = vmatprep.subr.bf16.mxu0 %v3686_v40  ;;  %v3710_v55 = vld [vmem:[#allocation7 + $0x20] sm:$0xff]   ;;  %v3719_v62 = vld [vmem:[#allocation7 + $0xf0] sm:$0xff]  }
 0x237   :  { %1953 = vmatprep.mubr.bf16.mxu1 %v1058_v43  ;;  %2179 = vmatprep.mubr.bf16.mxu0 %v1058_v43  ;;  %v3712_v56 = vld [vmem:[#allocation7 + $0xa0] sm:$0xff]   ;;  %v3718_v63 = vld [vmem:[#allocation7 + $0x30] sm:$0xff]  }
 0x238   :  { %1954 = vmatmul.mubr.bf16.gmra.mrb[60].mxu1 %v1057_v16  ;;  %2180 = vmatmul.mubr.bf16.gmra.mrb[92].mxu0 %v1057_v16  ;;  %v3720_v1 = vld [vmem:[#allocation7 + $0xb0] sm:$0xff]  }
 0x239   :  { %1993 = vmatpush1.bf16.msra.mxu1 %v3681_v18  ;;  %1996 = vmatprep.mubr.bf16.mxu1 %v4083_v8 }
 0x23a   :  { %2219 = vmatpush1.bf16.msra.mxu0 %v3684_v19  ;;  %2222 = vmatprep.mubr.bf16.mxu0 %v4083_v8  ;;  %v3698_v8 = vld [vmem:[#allocation7 + $0x8] sm:$0xff]  }
 0x23b   :  { %1994 = vmatprep.subr.bf16.mxu1 %v3689_v20  ;;  %2220 = vmatprep.subr.bf16.mxu0 %v3692_v21 }
 0x23d   :  { %1995 = vmatpush1.bf16.msra.mxu1 %v3687_v22 }
 0x23e   :  { %2221 = vmatpush1.bf16.msra.mxu0 %v3690_v23  ;;  %3129 = vmatprep.subr.bf16.mxu1 %v3693_v24 }
 0x23f   :  { %3193 = vmatprep.subr.bf16.mxu0 %v3695_v39 }
 0x240   :  { %1997 = vmatmul.mubr.bf16.vlgmr.msra.gmra.mrb[32].mxu1 %v4081_v6 }
 0x241   :  { %2223 = vmatmul.mubr.bf16.vlgmr.msra.gmra.mrb[64].mxu0 %v4081_v6  ;;  %2006 = vmatprep.mubr.bf16.mxu1 %v4095_v52  ;;  %v3707_v6 = vld [vmem:[#allocation7 + $0xd8] sm:$0xff]  }
 0x242   :  { %2232 = vmatprep.mubr.bf16.mxu0 %v4095_v52  ;;  %3130 = vmatpush3.bf16.msra.mxu1 %v3694_v27  ;;  %v3706_v52 = vld [vmem:[#allocation7 + $0x18] sm:$0xff]  }
 0x243   :  { %3194 = vmatpush3.bf16.msra.mxu0 %v3696_v29  ;;  %3131 = vmatprep.subr.bf16.mxu1 %v3697_v30 }
 0x244   :  { %3195 = vmatprep.subr.bf16.mxu0 %v3699_v0 }
 0x246   :  { %3132 = vmatpush3.bf16.msra.mxu1 %v3698_v8 }
 0x247   :  { %3196 = vmatpush3.bf16.msra.mxu0 %v3700_v31  ;;  %3133 = vmatprep.subr.bf16.mxu1 %v3701_v33 }
 0x248   :  { %2007 = vmatmul.mubr.bf16.gmra.mrb[36].mxu1 %v4093_v50  ;;  %3197 = vmatprep.subr.bf16.mxu0 %v3703_v44 }
 0x249   :  { %2233 = vmatmul.mubr.bf16.gmra.mrb[68].mxu0 %v4093_v50  ;;  %2016 = vmatprep.mubr.bf16.mxu1 %v4107_v25  ;;  %v3715_v50 = vld [vmem:[#allocation7 + $0xe8] sm:$0xff]  }
 0x24a   :  { %2242 = vmatprep.mubr.bf16.mxu0 %v4107_v25  ;;  %3134 = vmatpush3.bf16.msra.mxu1 %v3702_v46  ;;  %v3714_v25 = vld [vmem:[#allocation7 + $0x28] sm:$0xff]  }
 0x24b   :  { %3198 = vmatpush3.bf16.msra.mxu0 %v3704_v48  ;;  %3135 = vmatprep.subr.bf16.mxu1 %v3705_v49 }
 0x24c   :  { %3199 = vmatprep.subr.bf16.mxu0 %v3707_v6 }
 0x24e   :  { %3136 = vmatpush3.bf16.msra.mxu1 %v3706_v52 }
 0x24f   :  { %3200 = vmatpush3.bf16.msra.mxu0 %v3708_v51  ;;  %3137 = vmatprep.subr.bf16.mxu1 %v3709_v53 }
 0x250   :  { %2017 = vmatmul.mubr.bf16.gmra.mrb[40].mxu1 %v4105_v38  ;;  %3201 = vmatprep.subr.bf16.mxu0 %v3711_v54 }
 0x251   :  { %2243 = vmatmul.mubr.bf16.gmra.mrb[72].mxu0 %v4105_v38  ;;  %2026 = vmatprep.mubr.bf16.mxu1 %v4119_v12  ;;  %v3721_v38 = vld [vmem:[#allocation7 + $0x78] sm:$0xff]  }
 0x252   :  { %2252 = vmatprep.mubr.bf16.mxu0 %v4119_v12  ;;  %3138 = vmatpush3.bf16.msra.mxu1 %v3710_v55  ;;  %v3722_v12 = vld [vmem:[#allocation7 + $0x38] sm:$0xff]  }
 0x253   :  { %3202 = vmatpush3.bf16.msra.mxu0 %v3712_v56  ;;  %3139 = vmatprep.subr.bf16.mxu1 %v3713_v57 }
 0x254   :  { %3203 = vmatprep.subr.bf16.mxu0 %v3715_v50 }
 0x256   :  { %3140 = vmatpush3.bf16.msra.mxu1 %v3714_v25 }
 0x257   :  { %3204 = vmatpush3.bf16.msra.mxu0 %v3716_v59  ;;  %3141 = vmatprep.subr.bf16.mxu1 %v3717_v61 }
 0x258   :  { %2027 = vmatmul.mubr.bf16.gmra.mrb[44].mxu1 %v4117_v10  ;;  %3205 = vmatprep.subr.bf16.mxu0 %v3719_v62 }
 0x259   :  { %2253 = vmatmul.mubr.bf16.gmra.mrb[76].mxu0 %v4117_v10  ;;  %2036 = vmatprep.mubr.bf16.mxu1 %v4131_v60  ;;  %v3723_v10 = vld [vmem:[#allocation7 + $0xf8] sm:$0xff]  }
 0x25a   :  { %2262 = vmatprep.mubr.bf16.mxu0 %v4131_v60  ;;  %3142 = vmatpush3.bf16.msra.mxu1 %v3718_v63  ;;  %v1189_v60 = vld [vmem:[%s4321_s6] sm:$0xf] }
 0x25b   :  { %3206 = vmatpush3.bf16.msra.mxu0 %v3720_v1  ;;  %3143 = vmatprep.subr.bf16.mxu1 %v3721_v38 }
 0x25c   :  { %3207 = vmatprep.subr.bf16.mxu0 %v3723_v10 }
 0x25e   :  { %3144 = vmatpush3.bf16.msra.mxu1 %v3722_v12 }
 0x260   :  { %2037 = vmatmul.mubr.bf16.gmra.mrb[48].mxu1 %v4129_v58 }
 0x261   :  { %2263 = vmatmul.mubr.bf16.gmra.mrb[80].mxu0 %v4129_v58  ;;  %2046 = vmatprep.mubr.bf16.mxu1 %v4143_v47  ;;  %v3724_v58 = vld [vmem:[#allocation7 + $0xb8] sm:$0xff]  }
 0x262   :  { %2272 = vmatprep.mubr.bf16.mxu0 %v4143_v47  ;;  %3208 = vmatpush3.bf16.msra.mxu0 %v3724_v58  ;;  %v4209_v47 = vrot.slane %v1189_v60, %v409_v32 }
 0x268   :  { %2047 = vmatmul.mubr.bf16.gmra.mrb[52].mxu1 %v4141_v45 }
 0x269   :  { %2273 = vmatmul.mubr.bf16.gmra.mrb[84].mxu0 %v4141_v45  ;;  %2056 = vmatprep.mubr.bf16.mxu1 %v4155_v28  ;;  %v4205_v45 = vrot.slane %v1189_v60, %v4008_v35 }
 0x26a   :  { %2282 = vmatprep.mubr.bf16.mxu0 %v4155_v28  ;;  %v4216_v28 = vrot.slane %v1189_v60, %v413_v36 }
 0x270   :  { %2057 = vmatmul.mubr.bf16.gmra.mrb[56].mxu1 %v4153_v26 }
 0x271   :  { %2283 = vmatmul.mubr.bf16.gmra.mrb[88].mxu0 %v4153_v26  ;;  %2066 = vmatprep.mubr.bf16.mxu1 %v4167_v17  ;;  %v4212_v26 = vrot.slane %v1189_v60, %v4014_v37 }
 0x272   :  { %2292 = vmatprep.mubr.bf16.mxu0 %v4167_v17 }
 0x278   :  { %2067 = vmatmul.mubr.bf16.gmra.mrb[60].mxu1 %v4165_v42 }
 0x279   :  { %2293 = vmatmul.mubr.bf16.gmra.mrb[92].mxu0 %v4165_v42 }
 0x313   :  { %v1998_v2 = vpop.f32.mrb[32].mxu1 }
 0x314   :  { %v3257_v3 = vadd.f32 %v1998_v2, %v4205_v45  ;;  %v2224_v4 = vpop.f32.mrb[64].mxu0  ;;  %v2000_v5 = vpop.f32.mrb[33].mxu1 }
 0x315   :  { %v3289_v7 = vadd.f32 %v2224_v4, %v4209_v47  ;;  %v3258_v35 = vadd.f32 %v2000_v5, %v4212_v26  ;;  %v2226_v9 = vpop.f32.mrb[65].mxu0  ;;  %v2002_v11 = vpop.f32.mrb[34].mxu1 }
 0x316   :  { %v3290_v32 = vadd.f32 %v2226_v9, %v4216_v28  ;;  %v3259_v37 = vadd.f32 %v2002_v11, %v4205_v45  ;;  %v2228_v40 = vpop.f32.mrb[66].mxu0  ;;  %v2004_v41 = vpop.f32.mrb[35].mxu1  ;;  %v2303_v14 = vmax.f32 %v3257_v3, 0.0 }
 0x317   :  { %v3291_v34 = vadd.f32 %v2228_v40, %v4209_v47  ;;  %v3260_v36 = vadd.f32 %v2004_v41, %v4212_v26  ;;  %v2230_v13 = vpop.f32.mrb[67].mxu0  ;;  %v2305_v42 = vmax.f32 %v3289_v7, 0.0  ;;  %v2304_v43 = vmax.f32 %v3258_v35, 0.0 }
 0x318   :  { %v2307_v15 = vmax.f32 %v3259_v37, 0.0  ;;  %v3292_v16 = vadd.f32 %v2230_v13, %v4216_v28  ;;  %v2306_v19 = vmax.f32 %v3290_v32, 0.0 }
 0x319   :  { %v2309_v17 = vmax.f32 %v3291_v34, 0.0  ;;  %v2308_v18 = vmax.f32 %v3260_v36, 0.0 }
 0x31a   :  { %v2367_v20 = vpack.c.bf16 %v2307_v15, %v2303_v14  ;;  %v2310_v21 = vmax.f32 %v3292_v16, 0.0 }
 0x31b   :  { %v2369_v22 = vpack.c.bf16 %v2309_v17, %v2305_v42  ;;  %v2368_v23 = vpack.c.bf16 %v2308_v18, %v2304_v43  ;;  %v2008_v24 = vpop.f32.mrb[36].mxu1 }
 0x31c   :  { %v2370_v39 = vpack.c.bf16 %v2310_v21, %v2306_v19  ;;  %v3261_v27 = vadd.f32 %v2008_v24, %v4205_v45  ;;  %v2234_v29 = vpop.f32.mrb[68].mxu0  ;;  %v2010_v30 = vpop.f32.mrb[37].mxu1 }
 0x31d   :  { %v3293_v0 = vadd.f32 %v2234_v29, %v4209_v47  ;;  %v3262_v8 = vadd.f32 %v2010_v30, %v4212_v26  ;;  %v2236_v31 = vpop.f32.mrb[69].mxu0  ;;  %v2012_v33 = vpop.f32.mrb[38].mxu1  ;;  %2694 = vmatprep.mubr.bf16.mxu1 %v2368_v23 }
 0x31e   :  { %v3294_v44 = vadd.f32 %v2236_v31, %v4216_v28  ;;  %v3263_v46 = vadd.f32 %v2012_v33, %v4205_v45  ;;  %v2238_v48 = vpop.f32.mrb[70].mxu0  ;;  %2791 = vmatprep.mubr.bf16.mxu0 %v2370_v39  ;;  %v2014_v49 = vpop.f32.mrb[39].mxu1  ;;  %2695 = vmatmul.mubr.bf16.vlgmr.msra.gmra.mrb[64].mxu1 %v2367_v20  ;;  %v2311_v53 = vmax.f32 %v3261_v27, 0.0 }
 0x31f   :  { %v3295_v6 = vadd.f32 %v2238_v48, %v4209_v47  ;;  %v3264_v52 = vadd.f32 %v2014_v49, %v4212_v26  ;;  %v2240_v51 = vpop.f32.mrb[71].mxu0  ;;  %2792 = vmatmul.mubr.bf16.vlgmr.msra.gmra.mrb[96].mxu0 %v2369_v22  ;;  %v2313_v56 = vmax.f32 %v3293_v0, 0.0  ;;  %v2312_v57 = vmax.f32 %v3262_v8, 0.0 }
 0x320   :  { %v2315_v54 = vmax.f32 %v3263_v46, 0.0  ;;  %v3296_v55 = vadd.f32 %v2240_v51, %v4216_v28  ;;  %v2314_v59 = vmax.f32 %v3294_v44, 0.0 }
 0x321   :  { %v2317_v50 = vmax.f32 %v3295_v6, 0.0  ;;  %v2316_v25 = vmax.f32 %v3264_v52, 0.0 }
 0x322   :  { %v2371_v61 = vpack.c.bf16 %v2315_v54, %v2311_v53  ;;  %v2318_v62 = vmax.f32 %v3296_v55, 0.0 }
 0x323   :  { %v2373_v63 = vpack.c.bf16 %v2317_v50, %v2313_v56  ;;  %v2372_v1 = vpack.c.bf16 %v2316_v25, %v2312_v57  ;;  %v2018_v38 = vpop.f32.mrb[40].mxu1 }
 0x324   :  { %v2374_v10 = vpack.c.bf16 %v2318_v62, %v2314_v59  ;;  %v3265_v12 = vadd.f32 %v2018_v38, %v4205_v45  ;;  %v2244_v58 = vpop.f32.mrb[72].mxu0  ;;  %v2020_v60 = vpop.f32.mrb[41].mxu1 }
 0x325   :  { %v3297_v2 = vadd.f32 %v2244_v58, %v4209_v47  ;;  %v3266_v3 = vadd.f32 %v2020_v60, %v4212_v26  ;;  %v2246_v4 = vpop.f32.mrb[73].mxu0  ;;  %v2022_v5 = vpop.f32.mrb[42].mxu1  ;;  %2702 = vmatprep.mubr.bf16.mxu1 %v2372_v1 }
 0x326   :  { %v3298_v7 = vadd.f32 %v2246_v4, %v4216_v28  ;;  %v3267_v35 = vadd.f32 %v2022_v5, %v4205_v45  ;;  %v2248_v9 = vpop.f32.mrb[74].mxu0  ;;  %2799 = vmatprep.mubr.bf16.mxu0 %v2374_v10  ;;  %v2024_v11 = vpop.f32.mrb[43].mxu1  ;;  %2703 = vmatmul.mubr.bf16.gmra.mrb[68].mxu1 %v2371_v61  ;;  %v2319_v41 = vmax.f32 %v3265_v12, 0.0 }
 0x327   :  { %v3299_v32 = vadd.f32 %v2248_v9, %v4209_v47  ;;  %v3268_v37 = vadd.f32 %v2024_v11, %v4212_v26  ;;  %v2250_v40 = vpop.f32.mrb[75].mxu0  ;;  %2800 = vmatmul.mubr.bf16.gmra.mrb[100].mxu0 %v2373_v63  ;;  %v2321_v13 = vmax.f32 %v3297_v2, 0.0  ;;  %v2320_v14 = vmax.f32 %v3266_v3, 0.0 }
 0x328   :  { %v2323_v34 = vmax.f32 %v3267_v35, 0.0  ;;  %v3300_v36 = vadd.f32 %v2250_v40, %v4216_v28  ;;  %v2322_v42 = vmax.f32 %v3298_v7, 0.0 }
 0x329   :  { %v2325_v15 = vmax.f32 %v3299_v32, 0.0  ;;  %v2324_v16 = vmax.f32 %v3268_v37, 0.0 }
 0x32a   :  { %v2375_v43 = vpack.c.bf16 %v2323_v34, %v2319_v41  ;;  %v2326_v17 = vmax.f32 %v3300_v36, 0.0 }
 0x32b   :  { %v2377_v18 = vpack.c.bf16 %v2325_v15, %v2321_v13  ;;  %v2376_v19 = vpack.c.bf16 %v2324_v16, %v2320_v14  ;;  %v2028_v20 = vpop.f32.mrb[44].mxu1 }
 0x32c   :  { %v2378_v21 = vpack.c.bf16 %v2326_v17, %v2322_v42  ;;  %v3269_v22 = vadd.f32 %v2028_v20, %v4205_v45  ;;  %v2254_v23 = vpop.f32.mrb[76].mxu0  ;;  %v2030_v24 = vpop.f32.mrb[45].mxu1 }
 0x32d   :  { %v3301_v39 = vadd.f32 %v2254_v23, %v4209_v47  ;;  %v3270_v27 = vadd.f32 %v2030_v24, %v4212_v26  ;;  %v2256_v29 = vpop.f32.mrb[77].mxu0  ;;  %v2032_v30 = vpop.f32.mrb[46].mxu1  ;;  %2710 = vmatprep.mubr.bf16.mxu1 %v2376_v19 }
 0x32e   :  { %v3302_v0 = vadd.f32 %v2256_v29, %v4216_v28  ;;  %v3271_v8 = vadd.f32 %v2032_v30, %v4205_v45  ;;  %v2258_v31 = vpop.f32.mrb[78].mxu0  ;;  %2807 = vmatprep.mubr.bf16.mxu0 %v2378_v21  ;;  %v2034_v33 = vpop.f32.mrb[47].mxu1  ;;  %2711 = vmatmul.mubr.bf16.gmra.mrb[72].mxu1 %v2375_v43  ;;  %v2327_v49 = vmax.f32 %v3269_v22, 0.0 }
 0x32f   :  { %v3303_v44 = vadd.f32 %v2258_v31, %v4209_v47  ;;  %v3272_v46 = vadd.f32 %v2034_v33, %v4212_v26  ;;  %v2260_v48 = vpop.f32.mrb[79].mxu0  ;;  %2808 = vmatmul.mubr.bf16.gmra.mrb[104].mxu0 %v2377_v18  ;;  %v2329_v51 = vmax.f32 %v3301_v39, 0.0  ;;  %v2328_v53 = vmax.f32 %v3270_v27, 0.0 }
 0x330   :  { %v2331_v6 = vmax.f32 %v3271_v8, 0.0  ;;  %v3304_v52 = vadd.f32 %v2260_v48, %v4216_v28  ;;  %v2330_v56 = vmax.f32 %v3302_v0, 0.0 }
 0x331   :  { %v2333_v54 = vmax.f32 %v3303_v44, 0.0  ;;  %v2332_v55 = vmax.f32 %v3272_v46, 0.0 }
 0x332   :  { %v2379_v57 = vpack.c.bf16 %v2331_v6, %v2327_v49  ;;  %v2334_v50 = vmax.f32 %v3304_v52, 0.0 }
 0x333   :  { %v2381_v25 = vpack.c.bf16 %v2333_v54, %v2329_v51  ;;  %v2380_v59 = vpack.c.bf16 %v2332_v55, %v2328_v53  ;;  %v2038_v61 = vpop.f32.mrb[48].mxu1 }
 0x334   :  { %v2382_v62 = vpack.c.bf16 %v2334_v50, %v2330_v56  ;;  %v3273_v63 = vadd.f32 %v2038_v61, %v4205_v45  ;;  %v2264_v1 = vpop.f32.mrb[80].mxu0  ;;  %v2040_v38 = vpop.f32.mrb[49].mxu1 }
 0x335   :  { %v3305_v10 = vadd.f32 %v2264_v1, %v4209_v47  ;;  %v3274_v12 = vadd.f32 %v2040_v38, %v4212_v26  ;;  %v2266_v58 = vpop.f32.mrb[81].mxu0  ;;  %v2042_v60 = vpop.f32.mrb[50].mxu1  ;;  %2718 = vmatprep.mubr.bf16.mxu1 %v2380_v59 }
 0x336   :  { %v3306_v2 = vadd.f32 %v2266_v58, %v4216_v28  ;;  %v3275_v3 = vadd.f32 %v2042_v60, %v4205_v45  ;;  %v2268_v4 = vpop.f32.mrb[82].mxu0  ;;  %2815 = vmatprep.mubr.bf16.mxu0 %v2382_v62  ;;  %v2044_v5 = vpop.f32.mrb[51].mxu1  ;;  %2719 = vmatmul.mubr.bf16.gmra.mrb[76].mxu1 %v2379_v57  ;;  %v2335_v11 = vmax.f32 %v3273_v63, 0.0 }
 0x337   :  { %v3307_v7 = vadd.f32 %v2268_v4, %v4209_v47  ;;  %v3276_v35 = vadd.f32 %v2044_v5, %v4212_v26  ;;  %v2270_v9 = vpop.f32.mrb[83].mxu0  ;;  %2816 = vmatmul.mubr.bf16.gmra.mrb[108].mxu0 %v2381_v25  ;;  %v2337_v40 = vmax.f32 %v3305_v10, 0.0  ;;  %v2336_v41 = vmax.f32 %v3274_v12, 0.0 }
 0x338   :  { %v2339_v32 = vmax.f32 %v3275_v3, 0.0  ;;  %v3308_v37 = vadd.f32 %v2270_v9, %v4216_v28  ;;  %v2338_v13 = vmax.f32 %v3306_v2, 0.0 }
 0x339   :  { %v2341_v34 = vmax.f32 %v3307_v7, 0.0  ;;  %v2340_v36 = vmax.f32 %v3276_v35, 0.0 }
 0x33a   :  { %v2383_v14 = vpack.c.bf16 %v2339_v32, %v2335_v11  ;;  %v2342_v15 = vmax.f32 %v3308_v37, 0.0 }
 0x33b   :  { %v2385_v16 = vpack.c.bf16 %v2341_v34, %v2337_v40  ;;  %v2384_v42 = vpack.c.bf16 %v2340_v36, %v2336_v41  ;;  %v2048_v43 = vpop.f32.mrb[52].mxu1 }
 0x33c   :  { %v2386_v17 = vpack.c.bf16 %v2342_v15, %v2338_v13  ;;  %v3277_v18 = vadd.f32 %v2048_v43, %v4205_v45  ;;  %v2274_v19 = vpop.f32.mrb[84].mxu0  ;;  %v2050_v20 = vpop.f32.mrb[53].mxu1 }
 0x33d   :  { %v3309_v21 = vadd.f32 %v2274_v19, %v4209_v47  ;;  %v3278_v22 = vadd.f32 %v2050_v20, %v4212_v26  ;;  %v2276_v23 = vpop.f32.mrb[85].mxu0  ;;  %v2052_v24 = vpop.f32.mrb[54].mxu1  ;;  %2726 = vmatprep.mubr.bf16.mxu1 %v2384_v42 }
 0x33e   :  { %v3310_v39 = vadd.f32 %v2276_v23, %v4216_v28  ;;  %v3279_v27 = vadd.f32 %v2052_v24, %v4205_v45  ;;  %v2278_v29 = vpop.f32.mrb[86].mxu0  ;;  %2823 = vmatprep.mubr.bf16.mxu0 %v2386_v17  ;;  %v2054_v30 = vpop.f32.mrb[55].mxu1  ;;  %2727 = vmatmul.mubr.bf16.gmra.mrb[80].mxu1 %v2383_v14  ;;  %v2343_v33 = vmax.f32 %v3277_v18, 0.0 }
 0x33f   :  { %v3311_v0 = vadd.f32 %v2278_v29, %v4209_v47  ;;  %v3280_v8 = vadd.f32 %v2054_v30, %v4212_v26  ;;  %v2280_v31 = vpop.f32.mrb[87].mxu0  ;;  %2824 = vmatmul.mubr.bf16.gmra.mrb[112].mxu0 %v2385_v16  ;;  %v2345_v48 = vmax.f32 %v3309_v21, 0.0  ;;  %v2344_v49 = vmax.f32 %v3278_v22, 0.0 }
 0x340   :  { %v2347_v44 = vmax.f32 %v3279_v27, 0.0  ;;  %v3312_v46 = vadd.f32 %v2280_v31, %v4216_v28  ;;  %v2346_v51 = vmax.f32 %v3310_v39, 0.0 }
 0x341   :  { %v2349_v6 = vmax.f32 %v3311_v0, 0.0  ;;  %v2348_v52 = vmax.f32 %v3280_v8, 0.0 }
 0x342   :  { %v2387_v53 = vpack.c.bf16 %v2347_v44, %v2343_v33  ;;  %v2350_v54 = vmax.f32 %v3312_v46, 0.0 }
 0x343   :  { %v2389_v55 = vpack.c.bf16 %v2349_v6, %v2345_v48  ;;  %v2388_v56 = vpack.c.bf16 %v2348_v52, %v2344_v49  ;;  %v2058_v57 = vpop.f32.mrb[56].mxu1 }
 0x344   :  { %v2390_v50 = vpack.c.bf16 %v2350_v54, %v2346_v51  ;;  %v3281_v25 = vadd.f32 %v2058_v57, %v4205_v45  ;;  %v2284_v59 = vpop.f32.mrb[88].mxu0  ;;  %v2060_v61 = vpop.f32.mrb[57].mxu1 }
 0x345   :  { %v3313_v62 = vadd.f32 %v2284_v59, %v4209_v47  ;;  %v3282_v63 = vadd.f32 %v2060_v61, %v4212_v26  ;;  %v2286_v1 = vpop.f32.mrb[89].mxu0  ;;  %v2062_v38 = vpop.f32.mrb[58].mxu1  ;;  %2734 = vmatprep.mubr.bf16.mxu1 %v2388_v56 }
 0x346   :  { %v3314_v10 = vadd.f32 %v2286_v1, %v4216_v28  ;;  %v3283_v12 = vadd.f32 %v2062_v38, %v4205_v45  ;;  %v2288_v58 = vpop.f32.mrb[90].mxu0  ;;  %2831 = vmatprep.mubr.bf16.mxu0 %v2390_v50  ;;  %v2064_v60 = vpop.f32.mrb[59].mxu1  ;;  %2735 = vmatmul.mubr.bf16.gmra.mrb[84].mxu1 %v2387_v53  ;;  %v2351_v5 = vmax.f32 %v3281_v25, 0.0 }
 0x347   :  { %v3315_v2 = vadd.f32 %v2288_v58, %v4209_v47  ;;  %v3284_v3 = vadd.f32 %v2064_v60, %v4212_v26  ;;  %v2290_v4 = vpop.f32.mrb[91].mxu0  ;;  %2832 = vmatmul.mubr.bf16.gmra.mrb[116].mxu0 %v2389_v55  ;;  %v2353_v9 = vmax.f32 %v3313_v62, 0.0  ;;  %v2352_v11 = vmax.f32 %v3282_v63, 0.0 }
 0x348   :  { %v2355_v7 = vmax.f32 %v3283_v12, 0.0  ;;  %v3316_v35 = vadd.f32 %v2290_v4, %v4216_v28  ;;  %v2354_v40 = vmax.f32 %v3314_v10, 0.0 }
 0x349   :  { %v2357_v32 = vmax.f32 %v3315_v2, 0.0  ;;  %v2356_v37 = vmax.f32 %v3284_v3, 0.0 }
 0x34a   :  { %v2391_v41 = vpack.c.bf16 %v2355_v7, %v2351_v5  ;;  %v2358_v34 = vmax.f32 %v3316_v35, 0.0 }
 0x34b   :  { %v2393_v36 = vpack.c.bf16 %v2357_v32, %v2353_v9  ;;  %v2392_v13 = vpack.c.bf16 %v2356_v37, %v2352_v11  ;;  %v2068_v14 = vpop.f32.mrb[60].mxu1 }
 0x34c   :  { %v2394_v15 = vpack.c.bf16 %v2358_v34, %v2354_v40  ;;  %v3285_v16 = vadd.f32 %v2068_v14, %v4205_v45  ;;  %v2294_v42 = vpop.f32.mrb[92].mxu0  ;;  %v2070_v43 = vpop.f32.mrb[61].mxu1 }
 0x34d   :  { %v3317_v17 = vadd.f32 %v2294_v42, %v4209_v47  ;;  %v3286_v18 = vadd.f32 %v2070_v43, %v4212_v26  ;;  %v2296_v19 = vpop.f32.mrb[93].mxu0  ;;  %v2072_v20 = vpop.f32.mrb[62].mxu1  ;;  %2742 = vmatprep.mubr.bf16.mxu1 %v2392_v13 }
 0x34e   :  { %v3318_v21 = vadd.f32 %v2296_v19, %v4216_v28  ;;  %v3287_v22 = vadd.f32 %v2072_v20, %v4205_v45  ;;  %v2298_v23 = vpop.f32.mrb[94].mxu0  ;;  %2839 = vmatprep.mubr.bf16.mxu0 %v2394_v15  ;;  %v2074_v24 = vpop.f32.mrb[63].mxu1  ;;  %2743 = vmatmul.mubr.bf16.gmra.mrb[88].mxu1 %v2391_v41  ;;  %v2359_v30 = vmax.f32 %v3285_v16, 0.0 }
 0x34f   :  { %v3319_v39 = vadd.f32 %v2298_v23, %v4209_v47  ;;  %v3288_v27 = vadd.f32 %v2074_v24, %v4212_v26  ;;  %v2300_v29 = vpop.f32.mrb[95].mxu0  ;;  %2840 = vmatmul.mubr.bf16.gmra.mrb[120].mxu0 %v2393_v36  ;;  %v2361_v31 = vmax.f32 %v3317_v17, 0.0  ;;  %v2360_v33 = vmax.f32 %v3286_v18, 0.0 }
 0x350   :  { %v2363_v0 = vmax.f32 %v3287_v22, 0.0  ;;  %v3320_v8 = vadd.f32 %v2300_v29, %v4216_v28  ;;  %v2362_v48 = vmax.f32 %v3318_v21, 0.0  ;;  %v4285_v28 = vld [vmem:[%s4323_s8] ss:$0 sm:$0xff]  ;;  %s3827_s8 = smov [#allocation8]  }
 0x351   :  { %v2365_v44 = vmax.f32 %v3319_v39, 0.0  ;;  %v2364_v46 = vmax.f32 %v3288_v27, 0.0  ;;  %s2877_s21 = sshll.u32 %s3827_s8, 4  ;;  %s2878_s21 = int_to_ptr.vmem [resolvable:$true] %s2877_s21 }
 0x352   :  { %v2395_v45 = vpack.c.bf16 %v2363_v0, %v2359_v30  ;;  %v2366_v49 = vmax.f32 %v3320_v8, 0.0  ;;  %s3791_s22 = scalar_lea.vmem %s2878_s21, 2048  ;;  %p3796_p11 = scmp.lt.s32.totalorder %s2878_s21, %s2878_s21 }
 0x353   :  { %v2397_v6 = vpack.c.bf16 %v2365_v44, %v2361_v31  ;;  %v2396_v52 = vpack.c.bf16 %v2364_v46, %v2360_v33  ;;  %p3792_p10 = scmp.ne.s32.totalorder %s2878_s21, %s3791_s22  ;;  %p3797_p12 = scmp.lt.s32.totalorder %s3791_s22, %s3791_s22 }
 0x354   :  { %v2398_v51 = vpack.c.bf16 %v2366_v49, %v2362_v48 }
 0x355   :  { %2750 = vmatprep.mubr.bf16.mxu1 %v2396_v52  ;;  %p3798_p13 = por %p3797_p12, %p3796_p11 }
 0x356   :  { %2847 = vmatprep.mubr.bf16.mxu0 %v2398_v51  ;;  %2751 = vmatmul.mubr.bf16.gmra.mrb[92].mxu1 %v2395_v45 }
 0x357   :  { %2848 = vmatmul.mubr.bf16.gmra.mrb[124].mxu0 %v2397_v6  ;;  %p3799_p0 = pnand %p3798_p13, %p3792_p10 }
 0x3f1   :  { %v3145_v47 = vpop.f32.mrb[64].mxu1 }
 0x3f2   :  { %v3209_v26 = vpop.f32.mrb[96].mxu0  ;;  %v3146_v53 = vpop.f32.mrb[65].mxu1 }
 0x3f3   :  { %v3147_v54 = vadd.f32 %v3146_v53, %v3145_v47  ;;  %v3210_v55 = vpop.f32.mrb[97].mxu0  ;;  %v3148_v56 = vpop.f32.mrb[66].mxu1 }
 0x3f4   :  { %v3211_v57 = vadd.f32 %v3210_v55, %v3209_v26  ;;  %v3212_v50 = vpop.f32.mrb[98].mxu0  ;;  %v3149_v25 = vpop.f32.mrb[67].mxu1 }
 0x3f5   :  { %v2697_v59 = vadd.f32 %v3147_v54, %v4285_v28  ;;  %v3150_v61 = vadd.f32 %v3149_v25, %v3148_v56  ;;  %v3213_v62 = vpop.f32.mrb[99].mxu0 }
 0x3f6   :  { %v3214_v63 = vadd.f32 %v3213_v62, %v3212_v50 }
 0x3f7   :  { %v2794_v1 = vadd.f32 %v3211_v57, %v2697_v59  ;;  %v2700_v38 = vadd.f32 %v3150_v61, %v4285_v28 }
 0x3f9   :  { %2856 = vst [vmem:[#allocation8] sm:$0xff] %v2794_v1  ;;  %v2797_v10 = vadd.f32 %v3214_v63, %v2700_v38  ;;  %v3151_v12 = vpop.f32.mrb[68].mxu1 }
 0x3fa   :  { %v3215_v58 = vpop.f32.mrb[100].mxu0  ;;  %v3152_v60 = vpop.f32.mrb[69].mxu1 }
 0x3fb   :  { %2857 = vst [vmem:[#allocation8 + $0x8] sm:$0xff] %v2797_v10  ;;  %v3153_v2 = vadd.f32 %v3152_v60, %v3151_v12  ;;  %v3216_v3 = vpop.f32.mrb[101].mxu0  ;;  %v3154_v4 = vpop.f32.mrb[70].mxu1 }
 0x3fc   :  { %v3217_v5 = vadd.f32 %v3216_v3, %v3215_v58  ;;  %v3218_v7 = vpop.f32.mrb[102].mxu0  ;;  %v3155_v35 = vpop.f32.mrb[71].mxu1 }
 0x3fd   :  { %v2705_v9 = vadd.f32 %v3153_v2, %v4285_v28  ;;  %v3156_v11 = vadd.f32 %v3155_v35, %v3154_v4  ;;  %v3219_v32 = vpop.f32.mrb[103].mxu0 }
 0x3fe   :  { %v3220_v37 = vadd.f32 %v3219_v32, %v3218_v7 }
 0x3ff   :  { %v2802_v40 = vadd.f32 %v3217_v5, %v2705_v9  ;;  %v2708_v41 = vadd.f32 %v3156_v11, %v4285_v28 }
 0x401   :  { %2858 = vst [vmem:[#allocation8 + $0x10] sm:$0xff] %v2802_v40  ;;  %v2805_v34 = vadd.f32 %v3220_v37, %v2708_v41  ;;  %v3157_v36 = vpop.f32.mrb[72].mxu1 }
 0x402   :  { %v3221_v13 = vpop.f32.mrb[104].mxu0  ;;  %v3158_v14 = vpop.f32.mrb[73].mxu1 }
 0x403   :  { %2859 = vst [vmem:[#allocation8 + $0x18] sm:$0xff] %v2805_v34  ;;  %v3159_v15 = vadd.f32 %v3158_v14, %v3157_v36  ;;  %v3222_v16 = vpop.f32.mrb[105].mxu0  ;;  %v3160_v42 = vpop.f32.mrb[74].mxu1 }
 0x404   :  { %v3223_v43 = vadd.f32 %v3222_v16, %v3221_v13  ;;  %v3224_v17 = vpop.f32.mrb[106].mxu0  ;;  %v3161_v18 = vpop.f32.mrb[75].mxu1 }
 0x405   :  { %v2713_v19 = vadd.f32 %v3159_v15, %v4285_v28  ;;  %v3162_v20 = vadd.f32 %v3161_v18, %v3160_v42  ;;  %v3225_v21 = vpop.f32.mrb[107].mxu0 }
 0x406   :  { %v3226_v22 = vadd.f32 %v3225_v21, %v3224_v17 }
 0x407   :  { %v2810_v23 = vadd.f32 %v3223_v43, %v2713_v19  ;;  %v2716_v24 = vadd.f32 %v3162_v20, %v4285_v28 }
 0x409   :  { %2860 = vst [vmem:[#allocation8 + $0x20] sm:$0xff] %v2810_v23  ;;  %v2813_v39 = vadd.f32 %v3226_v22, %v2716_v24  ;;  %v3163_v27 = vpop.f32.mrb[76].mxu1 }
 0x40a   :  { %v3227_v29 = vpop.f32.mrb[108].mxu0  ;;  %v3164_v30 = vpop.f32.mrb[77].mxu1 }
 0x40b   :  { %2861 = vst [vmem:[#allocation8 + $0x28] sm:$0xff] %v2813_v39  ;;  %v3165_v0 = vadd.f32 %v3164_v30, %v3163_v27  ;;  %v3228_v8 = vpop.f32.mrb[109].mxu0  ;;  %v3166_v31 = vpop.f32.mrb[78].mxu1 }
 0x40c   :  { %v3229_v33 = vadd.f32 %v3228_v8, %v3227_v29  ;;  %v3230_v44 = vpop.f32.mrb[110].mxu0  ;;  %v3167_v46 = vpop.f32.mrb[79].mxu1 }
 0x40d   :  { %v2721_v48 = vadd.f32 %v3165_v0, %v4285_v28  ;;  %v3168_v45 = vadd.f32 %v3167_v46, %v3166_v31  ;;  %v3231_v49 = vpop.f32.mrb[111].mxu0 }
 0x40e   :  { %v3232_v6 = vadd.f32 %v3231_v49, %v3230_v44 }
 0x40f   :  { %v2818_v52 = vadd.f32 %v3229_v33, %v2721_v48  ;;  %v2724_v51 = vadd.f32 %v3168_v45, %v4285_v28 }
 0x411   :  { %2862 = vst [vmem:[#allocation8 + $0x30] sm:$0xff] %v2818_v52  ;;  %v2821_v47 = vadd.f32 %v3232_v6, %v2724_v51  ;;  %v3169_v26 = vpop.f32.mrb[80].mxu1 }
 0x412   :  { %v3233_v53 = vpop.f32.mrb[112].mxu0  ;;  %v3170_v54 = vpop.f32.mrb[81].mxu1 }
 0x413   :  { %2863 = vst [vmem:[#allocation8 + $0x38] sm:$0xff] %v2821_v47  ;;  %v3171_v55 = vadd.f32 %v3170_v54, %v3169_v26  ;;  %v3234_v56 = vpop.f32.mrb[113].mxu0  ;;  %v3172_v57 = vpop.f32.mrb[82].mxu1 }
 0x414   :  { %v3235_v50 = vadd.f32 %v3234_v56, %v3233_v53  ;;  %v3236_v25 = vpop.f32.mrb[114].mxu0  ;;  %v3173_v59 = vpop.f32.mrb[83].mxu1 }
 0x415   :  { %v2729_v61 = vadd.f32 %v3171_v55, %v4285_v28  ;;  %v3174_v62 = vadd.f32 %v3173_v59, %v3172_v57  ;;  %v3237_v63 = vpop.f32.mrb[115].mxu0 }
 0x416   :  { %v3238_v1 = vadd.f32 %v3237_v63, %v3236_v25 }
 0x417   :  { %v2826_v38 = vadd.f32 %v3235_v50, %v2729_v61  ;;  %v2732_v10 = vadd.f32 %v3174_v62, %v4285_v28 }
 0x419   :  { %2864 = vst [vmem:[#allocation8 + $0x40] sm:$0xff] %v2826_v38  ;;  %v2829_v12 = vadd.f32 %v3238_v1, %v2732_v10  ;;  %v3175_v58 = vpop.f32.mrb[84].mxu1 }
 0x41a   :  { %v3239_v60 = vpop.f32.mrb[116].mxu0  ;;  %v3176_v2 = vpop.f32.mrb[85].mxu1 }
 0x41b   :  { %2865 = vst [vmem:[#allocation8 + $0x48] sm:$0xff] %v2829_v12  ;;  %v3177_v3 = vadd.f32 %v3176_v2, %v3175_v58  ;;  %v3240_v4 = vpop.f32.mrb[117].mxu0  ;;  %v3178_v5 = vpop.f32.mrb[86].mxu1 }
 0x41c   :  { %v3241_v7 = vadd.f32 %v3240_v4, %v3239_v60  ;;  %v3242_v35 = vpop.f32.mrb[118].mxu0  ;;  %v3179_v9 = vpop.f32.mrb[87].mxu1 }
 0x41d   :  { %v2737_v11 = vadd.f32 %v3177_v3, %v4285_v28  ;;  %v3180_v32 = vadd.f32 %v3179_v9, %v3178_v5  ;;  %v3243_v37 = vpop.f32.mrb[119].mxu0 }
 0x41e   :  { %v3244_v40 = vadd.f32 %v3243_v37, %v3242_v35 }
 0x41f   :  { %v2834_v41 = vadd.f32 %v3241_v7, %v2737_v11  ;;  %v2740_v34 = vadd.f32 %v3180_v32, %v4285_v28 }
 0x421   :  { %2866 = vst [vmem:[#allocation8 + $0x50] sm:$0xff] %v2834_v41  ;;  %v2837_v36 = vadd.f32 %v3244_v40, %v2740_v34  ;;  %v3181_v13 = vpop.f32.mrb[88].mxu1 }
 0x422   :  { %v3245_v14 = vpop.f32.mrb[120].mxu0  ;;  %v3182_v15 = vpop.f32.mrb[89].mxu1 }
 0x423   :  { %2867 = vst [vmem:[#allocation8 + $0x58] sm:$0xff] %v2837_v36  ;;  %v3183_v16 = vadd.f32 %v3182_v15, %v3181_v13  ;;  %v3246_v42 = vpop.f32.mrb[121].mxu0  ;;  %v3184_v43 = vpop.f32.mrb[90].mxu1 }
 0x424   :  { %v3247_v17 = vadd.f32 %v3246_v42, %v3245_v14  ;;  %v3248_v18 = vpop.f32.mrb[122].mxu0  ;;  %v3185_v19 = vpop.f32.mrb[91].mxu1 }
 0x425   :  { %v2745_v20 = vadd.f32 %v3183_v16, %v4285_v28  ;;  %v3186_v21 = vadd.f32 %v3185_v19, %v3184_v43  ;;  %v3249_v22 = vpop.f32.mrb[123].mxu0 }
 0x426   :  { %v3250_v23 = vadd.f32 %v3249_v22, %v3248_v18 }
 0x427   :  { %v2842_v24 = vadd.f32 %v3247_v17, %v2745_v20  ;;  %v2748_v39 = vadd.f32 %v3186_v21, %v4285_v28 }
 0x429   :  { %2868 = vst [vmem:[#allocation8 + $0x60] sm:$0xff] %v2842_v24  ;;  %v2845_v27 = vadd.f32 %v3250_v23, %v2748_v39  ;;  %v3187_v29 = vpop.f32.mrb[92].mxu1 }
 0x42a   :  { %v3251_v30 = vpop.f32.mrb[124].mxu0  ;;  %v3188_v0 = vpop.f32.mrb[93].mxu1 }
 0x42b   :  { %2869 = vst [vmem:[#allocation8 + $0x68] sm:$0xff] %v2845_v27  ;;  %v3189_v8 = vadd.f32 %v3188_v0, %v3187_v29  ;;  %v3252_v31 = vpop.f32.mrb[125].mxu0  ;;  %v3190_v33 = vpop.f32.mrb[94].mxu1 }
 0x42c   :  { %v3253_v44 = vadd.f32 %v3252_v31, %v3251_v30  ;;  %v3254_v46 = vpop.f32.mrb[126].mxu0  ;;  %v3191_v48 = vpop.f32.mrb[95].mxu1 }
 0x42d   :  { %v2753_v45 = vadd.f32 %v3189_v8, %v4285_v28  ;;  %v3192_v49 = vadd.f32 %v3191_v48, %v3190_v33  ;;  %v3255_v6 = vpop.f32.mrb[127].mxu0 }
 0x42e   :  { %v3256_v52 = vadd.f32 %v3255_v6, %v3254_v46 }
 0x42f   :  { %v2850_v51 = vadd.f32 %v3253_v44, %v2753_v45  ;;  %v2756_v47 = vadd.f32 %v3192_v49, %v4285_v28 }
 0x431   :  { %2870 = vst [vmem:[#allocation8 + $0x70] sm:$0xff] %v2850_v51  ;;  %v2853_v26 = vadd.f32 %v3256_v52, %v2756_v47 }
 0x433   :  { %2871 = vst [vmem:[#allocation8 + $0x78] sm:$0xff] %v2853_v26 }
 0x434   :  { %3802 = shalt.err (!%p3799_p0)
}
 0x435   :  { %s3803_s28 = scalar_lea.hbm %s4324_s9, 2048 }
 0x436   :  { %p3804_p1 = scmp.ne.s32.totalorder %s4324_s9, %s3803_s28  ;;  %p3807_p2 = scmp.lt.u32.totalorder %s3803_s28, %s4324_s9 }
 0x438   :  { %p3809_p3 = pnand %p3807_p2, %p3804_p1 }
 0x43a   :  { %3812 = shalt.err (!%p3809_p3)
}
 0x43b   :  { %s3828_s13 = smov 128   ;;  %s3829_s5 = smov 8  }
 0x43c   :  { %2883 = dma.vmem_to_hbm [thread:$0]  %s2878_s21, 2048, %s4324_s9, [#allocation4], %s3828_s13, %s3828_s13, %s3829_s5  }
 0x43d   :  { %3817 = dma.done.wait [#allocation4], 2048  }
 0x43e   :  { %3818 = vsyncadd [#allocation4], 4294965248 }
 0x43f   :  { %2887 = vsyncpa [#allocation3], 1 }
 0x440   :  { %2888 = vsyncpa [#allocation6], 1 }
 0x441   :  { %2889 = vsyncpa [#allocation4], 1 }

</bundles_post_ra>
